<compile_context>
chip_gen: v7x
topology: tpu7x:2x2x1
jax: 0.10.0
libtpu: 0.0.40
codegen_flags: <defaults>
</compile_context>

<pallas_src>
import functools
import math

import jax
import jax.numpy as jnp
from jax import lax
from jax.experimental import pallas as pl
from jax.experimental.pallas import tpu as pltpu


def _layernorm(x, gamma, beta, eps=1e-6):
    mean = jnp.mean(x, axis=-1, keepdims=True)
    var = jnp.mean((x - mean) ** 2, axis=-1, keepdims=True)
    return (x - mean) * lax.rsqrt(var + eps) * gamma + beta


def _gelu_exact(x):
    # PyTorch nn.GELU default (erf-based, approximate='none')
    return 0.5 * x * (1.0 + lax.erf(x * (1.0 / math.sqrt(2.0))))


def block_kernel(num_heads, compute_dtype,
                 x_ref,
                 g1_ref, b1_ref,
                 wqkv_ref, bqkv_ref,
                 wproj_ref, bproj_ref,
                 g2_ref, b2_ref,
                 w1_ref, bf1_ref,
                 w2_ref, bf2_ref,
                 o_ref,
                 attn_sc):
    x = x_ref[...]                               # (BT, N, D)
    BT, N, D = x.shape
    head_dim = D // num_heads
    scale = 1.0 / math.sqrt(head_dim)
    M = BT * N

    # Hoist small parameter loads once per grid step (keep them 2-D: (1, F)).
    g1 = g1_ref[...]
    b1 = b1_ref[...]
    bqkv = bqkv_ref[...]
    bproj = bproj_ref[...]
    g2 = g2_ref[...]
    b2 = b2_ref[...]
    bf1 = bf1_ref[...]
    bf2 = bf2_ref[...]

    # Fold batch x tokens into the matmul M dimension.
    xm = x.reshape(M, D).astype(jnp.float32)     # (M, D)

    # ---- attention branch: x + Attn(LN1(x)) ----
    xn = _layernorm(xm, g1, b1)
    qkv = jnp.dot(xn.astype(compute_dtype), wqkv_ref[...],
                  preferred_element_type=jnp.float32) + bqkv        # (M, 3D) f32

    # Fold the 1/sqrt(head_dim) scale into q (cheaper than scaling NxN scores).
    q = (qkv[:, 0:D] * scale).astype(compute_dtype).reshape(BT, N, D)
    k = qkv[:, D:2 * D].astype(compute_dtype).reshape(BT, N, D)
    v = qkv[:, 2 * D:3 * D].astype(compute_dtype).reshape(BT, N, D)

    for h in range(num_heads):                   # static unroll (num_heads small)
        lo = h * head_dim
        hi = lo + head_dim
        qh = q[:, :, lo:hi]                      # (BT, N, hd)
        kh = k[:, :, lo:hi]
        vh = v[:, :, lo:hi]
        # Batched over images, contraction on last dims (no explicit transpose).
        s = jnp.einsum('bnd,bmd->bnm', qh, kh,
                       preferred_element_type=jnp.float32)           # (BT, N, N)
        s = s - jnp.max(s, axis=-1, keepdims=True)
        p = jnp.exp(s)
        inv = pl.reciprocal(jnp.sum(p, axis=-1, keepdims=True), approx=True)
        p = (p * inv).astype(compute_dtype)
        oh = jnp.einsum('bnm,bmd->bnd', p, vh,
                        preferred_element_type=jnp.float32)          # (BT, N, hd)
        attn_sc[:, :, lo:hi] = oh                # write head output into slab

    attn = attn_sc[...].reshape(M, D).astype(compute_dtype)
    proj = jnp.dot(attn, wproj_ref[...],
                   preferred_element_type=jnp.float32) + bproj
    x1 = xm + proj                               # (M, D) f32

    # ---- MLP branch: x1 + FC2(GELU(FC1(LN2(x1)))) ----
    xn2 = _layernorm(x1, g2, b2)
    hmid = jnp.dot(xn2.astype(compute_dtype), w1_ref[...],
                   preferred_element_type=jnp.float32) + bf1
    hmid = _gelu_exact(hmid)
    y = jnp.dot(hmid.astype(compute_dtype), w2_ref[...],
                preferred_element_type=jnp.float32) + bf2

    o_ref[...] = (x1 + y).reshape(BT, N, D).astype(o_ref.dtype)


PARAM_ORDER = ('g1', 'b1', 'wqkv', 'bqkv', 'wproj', 'bproj',
               'g2', 'b2', 'w1', 'bf1', 'w2', 'bf2')

# Weights that feed the MXU (cast to compute_dtype); LN params / biases stay f32.
_MATMUL_WEIGHTS = ('wqkv', 'wproj', 'w1', 'w2')


def _pick_batch_tile(B, N, target_rows=1024):
    """Largest divisor of B such that BT*N stays near the MXU-friendly M range."""
    target = max(1, target_rows // N)
    bt = 1
    for c in range(1, B + 1):
        if B % c == 0 and c <= target:
            bt = c
    return bt


def vit_block(x, params, num_heads, *, block_batch=None,
              compute_dtype=jnp.bfloat16):
    B, N, D = x.shape
    BT = block_batch if block_batch is not None else _pick_batch_tile(B, N)
    assert B % BT == 0, "batch must be divisible by the batch tile"

    prepared = {}
    for name in PARAM_ORDER:
        p = params[name]
        prepared[name] = p.astype(compute_dtype) if name in _MATMUL_WEIGHTS else p

    in_specs = [pl.BlockSpec((BT, N, D), lambda b: (b, 0, 0))]
    args = [x]
    for name in PARAM_ORDER:
        p = prepared[name]
        nd = p.ndim
        # Grid-invariant blocks: same block index every step -> stay resident.
        in_specs.append(pl.BlockSpec(p.shape, (lambda b, _nd=nd: (0,) * _nd)))
        args.append(p)

    return pl.pallas_call(
        functools.partial(block_kernel, num_heads, compute_dtype),
        out_shape=jax.ShapeDtypeStruct((B, N, D), x.dtype),
        grid=(B // BT,),
        in_specs=in_specs,
        out_specs=pl.BlockSpec((BT, N, D), lambda b: (b, 0, 0)),
        scratch_shapes=[pltpu.VMEM((BT, N, D), jnp.float32)],   # attention slab
        compiler_params=pltpu.CompilerParams(
            dimension_semantics=("parallel",),          # batch tiles are independent
            vmem_limit_bytes=64 * 1024 * 1024,           # headroom for larger shapes
        ),
    )(*args)


def make_params(key, dim, num_heads, mlp_ratio=4.0):
    hidden = int(dim * mlp_ratio)
    ks = jax.random.split(key, 8)
    s = 0.02
    params = {
        'g1':    jnp.ones((1, dim), jnp.float32),
        'b1':    jnp.zeros((1, dim), jnp.float32),
        'wqkv':  s * jax.random.normal(ks[0], (dim, 3 * dim), jnp.float32),
        'bqkv':  s * jax.random.normal(ks[1], (1, 3 * dim), jnp.float32),
        'wproj': s * jax.random.normal(ks[2], (dim, dim), jnp.float32),
        'bproj': s * jax.random.normal(ks[3], (1, dim), jnp.float32),
        'g2':    jnp.ones((1, dim), jnp.float32),
        'b2':    jnp.zeros((1, dim), jnp.float32),
        'w1':    s * jax.random.normal(ks[4], (dim, hidden), jnp.float32),
        'bf1':   s * jax.random.normal(ks[5], (1, hidden), jnp.float32),
        'w2':    s * jax.random.normal(ks[6], (hidden, dim), jnp.float32),
        'bf2':   s * jax.random.normal(ks[7], (1, dim), jnp.float32),
    }
    return params


def ref_block(x, params, num_heads):
    # pure-JAX f32 reference mirroring the PyTorch module (dropout p=0)
    def ln(v, g, b):
        m = v.mean(-1, keepdims=True)
        var = ((v - m) ** 2).mean(-1, keepdims=True)
        return (v - m) / jnp.sqrt(var + 1e-6) * g + b

    B, N, D = x.shape
    hd = D // num_heads
    xn = ln(x, params['g1'][0], params['b1'][0])
    qkv = xn @ params['wqkv'] + params['bqkv'][0]
    qkv = qkv.reshape(B, N, 3, num_heads, hd).transpose(2, 0, 3, 1, 4)
    q, k, v = qkv[0], qkv[1], qkv[2]
    s = jnp.einsum('bhnd,bhmd->bhnm', q, k) * (hd ** -0.5)
    p = jax.nn.softmax(s, axis=-1)
    o = jnp.einsum('bhnm,bhmd->bhnd', p, v).transpose(0, 2, 1, 3).reshape(B, N, D)
    x1 = x + o @ params['wproj'] + params['bproj'][0]
    xn2 = ln(x1, params['g2'][0], params['b2'][0])
    h = jax.nn.gelu(xn2 @ params['w1'] + params['bf1'][0], approximate=False)
    return x1 + h @ params['w2'] + params['bf2'][0]


if __name__ == "__main__":
    # Small but TPU-friendly shapes: D multiple of 128 (lane-dense stores),
    # N multiple of 8, batch tile of 2 -> grid of 2 exercises the pipeline.
    B, N, D, HEADS = 4, 16, 128, 4
    key = jax.random.PRNGKey(0)
    kx, kp = jax.random.split(key)
    x = jax.random.normal(kx, (B, N, D), jnp.float32)
    params = make_params(kp, D, HEADS, mlp_ratio=4.0)

    out = vit_block(x, params, HEADS, block_batch=2)
    out = jax.block_until_ready(out)

    ref = ref_block(x, params, HEADS)
    assert out.shape == (B, N, D)
    # bf16 weights / approx reciprocal => compare with a bf16-appropriate tolerance.
    max_err = float(jnp.max(jnp.abs(out - ref)))
    assert jnp.allclose(out, ref, atol=3e-2, rtol=3e-2), \
        f"mismatch vs JAX reference (max abs err = {max_err})"
    print("KERNEL_OK")
</pallas_src>

<mosaic_0001>
module attributes {stable_mosaic.version = 11 : i64} {
  func.func @block_kernel(%arg0: i32, %arg1: memref<2x16x128xf32, #tpu.memory_space<vmem>>, %arg2: memref<1x128xf32, #tpu.memory_space<vmem>>, %arg3: memref<1x128xf32, #tpu.memory_space<vmem>>, %arg4: memref<128x384xbf16, #tpu.memory_space<vmem>>, %arg5: memref<1x384xf32, #tpu.memory_space<vmem>>, %arg6: memref<128x128xbf16, #tpu.memory_space<vmem>>, %arg7: memref<1x128xf32, #tpu.memory_space<vmem>>, %arg8: memref<1x128xf32, #tpu.memory_space<vmem>>, %arg9: memref<1x128xf32, #tpu.memory_space<vmem>>, %arg10: memref<128x512xbf16, #tpu.memory_space<vmem>>, %arg11: memref<1x512xf32, #tpu.memory_space<vmem>>, %arg12: memref<512x128xbf16, #tpu.memory_space<vmem>>, %arg13: memref<1x128xf32, #tpu.memory_space<vmem>>, %arg14: memref<2x16x128xf32, #tpu.memory_space<vmem>>, %arg15: memref<2x16x128xf32, #tpu.memory_space<vmem>>) attributes {dimension_semantics = [#tpu.dimension_semantics<parallel>], iteration_bounds = array<i64: 2>, scalar_prefetch = 0 : i64, scratch_operands = 1 : i64, tpu.core_type = #tpu.core_type<tc>, window_params = [{transform_indices = @transform_0, window_bounds = array<i64: 2, 16, 128>}, {pipeline_mode = #tpu.pipeline_mode<synchronous>, transform_indices = @transform_1, window_bounds = array<i64: 1, 128>}, {pipeline_mode = #tpu.pipeline_mode<synchronous>, transform_indices = @transform_2, window_bounds = array<i64: 1, 128>}, {pipeline_mode = #tpu.pipeline_mode<synchronous>, transform_indices = @transform_3, window_bounds = array<i64: 128, 384>}, {pipeline_mode = #tpu.pipeline_mode<synchronous>, transform_indices = @transform_4, window_bounds = array<i64: 1, 384>}, {pipeline_mode = #tpu.pipeline_mode<synchronous>, transform_indices = @transform_5, window_bounds = array<i64: 128, 128>}, {pipeline_mode = #tpu.pipeline_mode<synchronous>, transform_indices = @transform_6, window_bounds = array<i64: 1, 128>}, {pipeline_mode = #tpu.pipeline_mode<synchronous>, transform_indices = @transform_7, window_bounds = array<i64: 1, 128>}, {pipeline_mode = #tpu.pipeline_mode<synchronous>, transform_indices = @transform_8, window_bounds = array<i64: 1, 128>}, {pipeline_mode = #tpu.pipeline_mode<synchronous>, transform_indices = @transform_9, window_bounds = array<i64: 128, 512>}, {pipeline_mode = #tpu.pipeline_mode<synchronous>, transform_indices = @transform_10, window_bounds = array<i64: 1, 512>}, {pipeline_mode = #tpu.pipeline_mode<synchronous>, transform_indices = @transform_11, window_bounds = array<i64: 512, 128>}, {pipeline_mode = #tpu.pipeline_mode<synchronous>, transform_indices = @transform_12, window_bounds = array<i64: 1, 128>}, {transform_indices = @transform_13, window_bounds = array<i64: 2, 16, 128>}]} {
    %c0 = arith.constant 0 : index
    %c0_0 = arith.constant 0 : index
    %c0_1 = arith.constant 0 : index
    %0 = vector.load %arg1[%c0, %c0_0, %c0_1] : memref<2x16x128xf32, #tpu.memory_space<vmem>>, vector<2x16x128xf32>
    %c0_2 = arith.constant 0 : index
    %c0_3 = arith.constant 0 : index
    %1 = vector.load %arg2[%c0_2, %c0_3] : memref<1x128xf32, #tpu.memory_space<vmem>>, vector<1x128xf32>
    %c0_4 = arith.constant 0 : index
    %c0_5 = arith.constant 0 : index
    %2 = vector.load %arg3[%c0_4, %c0_5] : memref<1x128xf32, #tpu.memory_space<vmem>>, vector<1x128xf32>
    %c0_6 = arith.constant 0 : index
    %c0_7 = arith.constant 0 : index
    %3 = vector.load %arg5[%c0_6, %c0_7] : memref<1x384xf32, #tpu.memory_space<vmem>>, vector<1x384xf32>
    %c0_8 = arith.constant 0 : index
    %c0_9 = arith.constant 0 : index
    %4 = vector.load %arg7[%c0_8, %c0_9] : memref<1x128xf32, #tpu.memory_space<vmem>>, vector<1x128xf32>
    %c0_10 = arith.constant 0 : index
    %c0_11 = arith.constant 0 : index
    %5 = vector.load %arg8[%c0_10, %c0_11] : memref<1x128xf32, #tpu.memory_space<vmem>>, vector<1x128xf32>
    %c0_12 = arith.constant 0 : index
    %c0_13 = arith.constant 0 : index
    %6 = vector.load %arg9[%c0_12, %c0_13] : memref<1x128xf32, #tpu.memory_space<vmem>>, vector<1x128xf32>
    %c0_14 = arith.constant 0 : index
    %c0_15 = arith.constant 0 : index
    %7 = vector.load %arg11[%c0_14, %c0_15] : memref<1x512xf32, #tpu.memory_space<vmem>>, vector<1x512xf32>
    %c0_16 = arith.constant 0 : index
    %c0_17 = arith.constant 0 : index
    %8 = vector.load %arg13[%c0_16, %c0_17] : memref<1x128xf32, #tpu.memory_space<vmem>>, vector<1x128xf32>
    %9 = vector.shape_cast %0 : vector<2x16x128xf32> to vector<32x128xf32>
    %cst = arith.constant dense<0.000000e+00> : vector<32xf32>
    %10 = vector.multi_reduction <add>, %9, %cst [1] : vector<32x128xf32> to vector<32xf32>
    %11 = vector.shape_cast %10 : vector<32xf32> to vector<32x1xf32>
    %cst_18 = arith.constant 1.280000e+02 : f32
    %12 = vector.broadcast %cst_18 : f32 to vector<32x1xf32>
    %13 = arith.divf %11, %12 : vector<32x1xf32>
    %14 = vector.broadcast %13 : vector<32x1xf32> to vector<32x128xf32>
    %15 = arith.subf %9, %14 : vector<32x128xf32>
    %16 = arith.mulf %15, %15 : vector<32x128xf32>
    %cst_19 = arith.constant dense<0.000000e+00> : vector<32xf32>
    %17 = vector.multi_reduction <add>, %16, %cst_19 [1] : vector<32x128xf32> to vector<32xf32>
    %18 = vector.shape_cast %17 : vector<32xf32> to vector<32x1xf32>
    %cst_20 = arith.constant 1.280000e+02 : f32
    %19 = vector.broadcast %cst_20 : f32 to vector<32x1xf32>
    %20 = arith.divf %18, %19 : vector<32x1xf32>
    %21 = vector.broadcast %13 : vector<32x1xf32> to vector<32x128xf32>
    %22 = arith.subf %9, %21 : vector<32x128xf32>
    %cst_21 = arith.constant 9.99999997E-7 : f32
    %23 = vector.broadcast %cst_21 : f32 to vector<32x1xf32>
    %24 = arith.addf %20, %23 : vector<32x1xf32>
    %25 = math.rsqrt %24 : vector<32x1xf32>
    %26 = vector.broadcast %25 : vector<32x1xf32> to vector<32x128xf32>
    %27 = arith.mulf %22, %26 : vector<32x128xf32>
    %28 = vector.broadcast %1 : vector<1x128xf32> to vector<32x128xf32>
    %29 = arith.mulf %27, %28 : vector<32x128xf32>
    %30 = vector.broadcast %2 : vector<1x128xf32> to vector<32x128xf32>
    %31 = arith.addf %29, %30 : vector<32x128xf32>
    %32 = arith.truncf %31 : vector<32x128xf32> to vector<32x128xbf16>
    %c0_22 = arith.constant 0 : index
    %c0_23 = arith.constant 0 : index
    %33 = vector.load %arg4[%c0_22, %c0_23] : memref<128x384xbf16, #tpu.memory_space<vmem>>, vector<128x384xbf16>
    %cst_24 = arith.constant dense<0.000000e+00> : vector<32x384xf32>
    %34 = tpu.matmul %32, %33, %cst_24 {dimension_numbers = #tpu.dot_dimension_numbers<[1], [0], [0], [1], [0, 0, 1, 1], [], []>} : vector<32x128xbf16>, vector<128x384xbf16>, vector<32x384xf32> -> vector<32x384xf32>
    %35 = vector.broadcast %3 : vector<1x384xf32> to vector<32x384xf32>
    %36 = arith.addf %34, %35 : vector<32x384xf32>
    %37 = vector.extract_strided_slice %36 {offsets = [0, 0], sizes = [32, 128], strides = [1, 1]} : vector<32x384xf32> to vector<32x128xf32>
    %cst_25 = arith.constant 0.176776692 : f32
    %38 = vector.broadcast %cst_25 : f32 to vector<32x128xf32>
    %39 = arith.mulf %37, %38 : vector<32x128xf32>
    %40 = arith.truncf %39 : vector<32x128xf32> to vector<32x128xbf16>
    %41 = vector.shape_cast %40 : vector<32x128xbf16> to vector<2x16x128xbf16>
    %42 = vector.extract_strided_slice %36 {offsets = [0, 128], sizes = [32, 128], strides = [1, 1]} : vector<32x384xf32> to vector<32x128xf32>
    %43 = arith.truncf %42 : vector<32x128xf32> to vector<32x128xbf16>
    %44 = vector.shape_cast %43 : vector<32x128xbf16> to vector<2x16x128xbf16>
    %45 = vector.extract_strided_slice %36 {offsets = [0, 256], sizes = [32, 128], strides = [1, 1]} : vector<32x384xf32> to vector<32x128xf32>
    %46 = arith.truncf %45 : vector<32x128xf32> to vector<32x128xbf16>
    %47 = vector.shape_cast %46 : vector<32x128xbf16> to vector<2x16x128xbf16>
    %48 = vector.extract_strided_slice %41 {offsets = [0, 0, 0], sizes = [2, 16, 32], strides = [1, 1, 1]} : vector<2x16x128xbf16> to vector<2x16x32xbf16>
    %49 = vector.extract_strided_slice %44 {offsets = [0, 0, 0], sizes = [2, 16, 32], strides = [1, 1, 1]} : vector<2x16x128xbf16> to vector<2x16x32xbf16>
    %50 = vector.extract_strided_slice %47 {offsets = [0, 0, 0], sizes = [2, 16, 32], strides = [1, 1, 1]} : vector<2x16x128xbf16> to vector<2x16x32xbf16>
    "tpu.trace_start"() <{level = 10 : i32, message = "bnd,bmd->bnm"}> : () -> ()
    %cst_26 = arith.constant dense<0.000000e+00> : vector<2x16x16xf32>
    %51 = tpu.matmul %48, %49, %cst_26 {dimension_numbers = #tpu.dot_dimension_numbers<[2], [2], [1], [1], [0, 0, 0, 1, 1, 1], [0], [0]>} : vector<2x16x32xbf16>, vector<2x16x32xbf16>, vector<2x16x16xf32> -> vector<2x16x16xf32>
    "tpu.trace_stop"() : () -> ()
    %cst_27 = arith.constant dense<0xFF800000> : vector<2x16xf32>
    %52 = vector.multi_reduction <maximumf>, %51, %cst_27 [2] : vector<2x16x16xf32> to vector<2x16xf32>
    %53 = vector.shape_cast %52 : vector<2x16xf32> to vector<2x16x1xf32>
    %54 = vector.broadcast %53 : vector<2x16x1xf32> to vector<2x16x16xf32>
    %55 = arith.subf %51, %54 : vector<2x16x16xf32>
    %56 = math.exp %55 : vector<2x16x16xf32>
    %cst_28 = arith.constant dense<0.000000e+00> : vector<2x16xf32>
    %57 = vector.multi_reduction <add>, %56, %cst_28 [2] : vector<2x16x16xf32> to vector<2x16xf32>
    %58 = vector.shape_cast %57 : vector<2x16xf32> to vector<2x16x1xf32>
    %59 = tpu.reciprocal %58 {approx = true} : vector<2x16x1xf32> -> vector<2x16x1xf32>
    %60 = vector.broadcast %59 : vector<2x16x1xf32> to vector<2x16x16xf32>
    %61 = arith.mulf %56, %60 : vector<2x16x16xf32>
    %62 = arith.truncf %61 : vector<2x16x16xf32> to vector<2x16x16xbf16>
    "tpu.trace_start"() <{level = 10 : i32, message = "bnm,bmd->bnd"}> : () -> ()
    %cst_29 = arith.constant dense<0.000000e+00> : vector<2x16x32xf32>
    %63 = tpu.matmul %62, %50, %cst_29 {dimension_numbers = #tpu.dot_dimension_numbers<[2], [1], [1], [2], [0, 0, 0, 1, 1, 2], [0], [0]>} : vector<2x16x16xbf16>, vector<2x16x32xbf16>, vector<2x16x32xf32> -> vector<2x16x32xf32>
    "tpu.trace_stop"() : () -> ()
    %c0_30 = arith.constant 0 : index
    %c0_31 = arith.constant 0 : index
    %c0_32 = arith.constant 0 : index
    %64 = vector.load %arg15[%c0_30, %c0_31, %c0_32] : memref<2x16x128xf32, #tpu.memory_space<vmem>>, vector<2x16x32xf32>
    tpu.vector_store %arg15[%c0_30, %c0_31, %c0_32], %63 {strides = array<i32>} : memref<2x16x128xf32, #tpu.memory_space<vmem>>, vector<2x16x32xf32>,
    %65 = vector.extract_strided_slice %41 {offsets = [0, 0, 32], sizes = [2, 16, 32], strides = [1, 1, 1]} : vector<2x16x128xbf16> to vector<2x16x32xbf16>
    %66 = vector.extract_strided_slice %44 {offsets = [0, 0, 32], sizes = [2, 16, 32], strides = [1, 1, 1]} : vector<2x16x128xbf16> to vector<2x16x32xbf16>
    %67 = vector.extract_strided_slice %47 {offsets = [0, 0, 32], sizes = [2, 16, 32], strides = [1, 1, 1]} : vector<2x16x128xbf16> to vector<2x16x32xbf16>
    "tpu.trace_start"() <{level = 10 : i32, message = "bnd,bmd->bnm"}> : () -> ()
    %cst_33 = arith.constant dense<0.000000e+00> : vector<2x16x16xf32>
    %68 = tpu.matmul %65, %66, %cst_33 {dimension_numbers = #tpu.dot_dimension_numbers<[2], [2], [1], [1], [0, 0, 0, 1, 1, 1], [0], [0]>} : vector<2x16x32xbf16>, vector<2x16x32xbf16>, vector<2x16x16xf32> -> vector<2x16x16xf32>
    "tpu.trace_stop"() : () -> ()
    %cst_34 = arith.constant dense<0xFF800000> : vector<2x16xf32>
    %69 = vector.multi_reduction <maximumf>, %68, %cst_34 [2] : vector<2x16x16xf32> to vector<2x16xf32>
    %70 = vector.shape_cast %69 : vector<2x16xf32> to vector<2x16x1xf32>
    %71 = vector.broadcast %70 : vector<2x16x1xf32> to vector<2x16x16xf32>
    %72 = arith.subf %68, %71 : vector<2x16x16xf32>
    %73 = math.exp %72 : vector<2x16x16xf32>
    %cst_35 = arith.constant dense<0.000000e+00> : vector<2x16xf32>
    %74 = vector.multi_reduction <add>, %73, %cst_35 [2] : vector<2x16x16xf32> to vector<2x16xf32>
    %75 = vector.shape_cast %74 : vector<2x16xf32> to vector<2x16x1xf32>
    %76 = tpu.reciprocal %75 {approx = true} : vector<2x16x1xf32> -> vector<2x16x1xf32>
    %77 = vector.broadcast %76 : vector<2x16x1xf32> to vector<2x16x16xf32>
    %78 = arith.mulf %73, %77 : vector<2x16x16xf32>
    %79 = arith.truncf %78 : vector<2x16x16xf32> to vector<2x16x16xbf16>
    "tpu.trace_start"() <{level = 10 : i32, message = "bnm,bmd->bnd"}> : () -> ()
    %cst_36 = arith.constant dense<0.000000e+00> : vector<2x16x32xf32>
    %80 = tpu.matmul %79, %67, %cst_36 {dimension_numbers = #tpu.dot_dimension_numbers<[2], [1], [1], [2], [0, 0, 0, 1, 1, 2], [0], [0]>} : vector<2x16x16xbf16>, vector<2x16x32xbf16>, vector<2x16x32xf32> -> vector<2x16x32xf32>
    "tpu.trace_stop"() : () -> ()
    %c0_37 = arith.constant 0 : index
    %c0_38 = arith.constant 0 : index
    %c32 = arith.constant 32 : index
    %81 = vector.load %arg15[%c0_37, %c0_38, %c32] : memref<2x16x128xf32, #tpu.memory_space<vmem>>, vector<2x16x32xf32>
    tpu.vector_store %arg15[%c0_37, %c0_38, %c32], %80 {strides = array<i32>} : memref<2x16x128xf32, #tpu.memory_space<vmem>>, vector<2x16x32xf32>,
    %82 = vector.extract_strided_slice %41 {offsets = [0, 0, 64], sizes = [2, 16, 32], strides = [1, 1, 1]} : vector<2x16x128xbf16> to vector<2x16x32xbf16>
    %83 = vector.extract_strided_slice %44 {offsets = [0, 0, 64], sizes = [2, 16, 32], strides = [1, 1, 1]} : vector<2x16x128xbf16> to vector<2x16x32xbf16>
    %84 = vector.extract_strided_slice %47 {offsets = [0, 0, 64], sizes = [2, 16, 32], strides = [1, 1, 1]} : vector<2x16x128xbf16> to vector<2x16x32xbf16>
    "tpu.trace_start"() <{level = 10 : i32, message = "bnd,bmd->bnm"}> : () -> ()
    %cst_39 = arith.constant dense<0.000000e+00> : vector<2x16x16xf32>
    %85 = tpu.matmul %82, %83, %cst_39 {dimension_numbers = #tpu.dot_dimension_numbers<[2], [2], [1], [1], [0, 0, 0, 1, 1, 1], [0], [0]>} : vector<2x16x32xbf16>, vector<2x16x32xbf16>, vector<2x16x16xf32> -> vector<2x16x16xf32>
    "tpu.trace_stop"() : () -> ()
    %cst_40 = arith.constant dense<0xFF800000> : vector<2x16xf32>
    %86 = vector.multi_reduction <maximumf>, %85, %cst_40 [2] : vector<2x16x16xf32> to vector<2x16xf32>
    %87 = vector.shape_cast %86 : vector<2x16xf32> to vector<2x16x1xf32>
    %88 = vector.broadcast %87 : vector<2x16x1xf32> to vector<2x16x16xf32>
    %89 = arith.subf %85, %88 : vector<2x16x16xf32>
    %90 = math.exp %89 : vector<2x16x16xf32>
    %cst_41 = arith.constant dense<0.000000e+00> : vector<2x16xf32>
    %91 = vector.multi_reduction <add>, %90, %cst_41 [2] : vector<2x16x16xf32> to vector<2x16xf32>
    %92 = vector.shape_cast %91 : vector<2x16xf32> to vector<2x16x1xf32>
    %93 = tpu.reciprocal %92 {approx = true} : vector<2x16x1xf32> -> vector<2x16x1xf32>
    %94 = vector.broadcast %93 : vector<2x16x1xf32> to vector<2x16x16xf32>
    %95 = arith.mulf %90, %94 : vector<2x16x16xf32>
    %96 = arith.truncf %95 : vector<2x16x16xf32> to vector<2x16x16xbf16>
    "tpu.trace_start"() <{level = 10 : i32, message = "bnm,bmd->bnd"}> : () -> ()
    %cst_42 = arith.constant dense<0.000000e+00> : vector<2x16x32xf32>
    %97 = tpu.matmul %96, %84, %cst_42 {dimension_numbers = #tpu.dot_dimension_numbers<[2], [1], [1], [2], [0, 0, 0, 1, 1, 2], [0], [0]>} : vector<2x16x16xbf16>, vector<2x16x32xbf16>, vector<2x16x32xf32> -> vector<2x16x32xf32>
    "tpu.trace_stop"() : () -> ()
    %c0_43 = arith.constant 0 : index
    %c0_44 = arith.constant 0 : index
    %c64 = arith.constant 64 : index
    %98 = vector.load %arg15[%c0_43, %c0_44, %c64] : memref<2x16x128xf32, #tpu.memory_space<vmem>>, vector<2x16x32xf32>
    tpu.vector_store %arg15[%c0_43, %c0_44, %c64], %97 {strides = array<i32>} : memref<2x16x128xf32, #tpu.memory_space<vmem>>, vector<2x16x32xf32>,
    %99 = vector.extract_strided_slice %41 {offsets = [0, 0, 96], sizes = [2, 16, 32], strides = [1, 1, 1]} : vector<2x16x128xbf16> to vector<2x16x32xbf16>
    %100 = vector.extract_strided_slice %44 {offsets = [0, 0, 96], sizes = [2, 16, 32], strides = [1, 1, 1]} : vector<2x16x128xbf16> to vector<2x16x32xbf16>
    %101 = vector.extract_strided_slice %47 {offsets = [0, 0, 96], sizes = [2, 16, 32], strides = [1, 1, 1]} : vector<2x16x128xbf16> to vector<2x16x32xbf16>
    "tpu.trace_start"() <{level = 10 : i32, message = "bnd,bmd->bnm"}> : () -> ()
    %cst_45 = arith.constant dense<0.000000e+00> : vector<2x16x16xf32>
    %102 = tpu.matmul %99, %100, %cst_45 {dimension_numbers = #tpu.dot_dimension_numbers<[2], [2], [1], [1], [0, 0, 0, 1, 1, 1], [0], [0]>} : vector<2x16x32xbf16>, vector<2x16x32xbf16>, vector<2x16x16xf32> -> vector<2x16x16xf32>
    "tpu.trace_stop"() : () -> ()
    %cst_46 = arith.constant dense<0xFF800000> : vector<2x16xf32>
    %103 = vector.multi_reduction <maximumf>, %102, %cst_46 [2] : vector<2x16x16xf32> to vector<2x16xf32>
    %104 = vector.shape_cast %103 : vector<2x16xf32> to vector<2x16x1xf32>
    %105 = vector.broadcast %104 : vector<2x16x1xf32> to vector<2x16x16xf32>
    %106 = arith.subf %102, %105 : vector<2x16x16xf32>
    %107 = math.exp %106 : vector<2x16x16xf32>
    %cst_47 = arith.constant dense<0.000000e+00> : vector<2x16xf32>
    %108 = vector.multi_reduction <add>, %107, %cst_47 [2] : vector<2x16x16xf32> to vector<2x16xf32>
    %109 = vector.shape_cast %108 : vector<2x16xf32> to vector<2x16x1xf32>
    %110 = tpu.reciprocal %109 {approx = true} : vector<2x16x1xf32> -> vector<2x16x1xf32>
    %111 = vector.broadcast %110 : vector<2x16x1xf32> to vector<2x16x16xf32>
    %112 = arith.mulf %107, %111 : vector<2x16x16xf32>
    %113 = arith.truncf %112 : vector<2x16x16xf32> to vector<2x16x16xbf16>
    "tpu.trace_start"() <{level = 10 : i32, message = "bnm,bmd->bnd"}> : () -> ()
    %cst_48 = arith.constant dense<0.000000e+00> : vector<2x16x32xf32>
    %114 = tpu.matmul %113, %101, %cst_48 {dimension_numbers = #tpu.dot_dimension_numbers<[2], [1], [1], [2], [0, 0, 0, 1, 1, 2], [0], [0]>} : vector<2x16x16xbf16>, vector<2x16x32xbf16>, vector<2x16x32xf32> -> vector<2x16x32xf32>
    "tpu.trace_stop"() : () -> ()
    %c0_49 = arith.constant 0 : index
    %c0_50 = arith.constant 0 : index
    %c96 = arith.constant 96 : index
    %115 = vector.load %arg15[%c0_49, %c0_50, %c96] : memref<2x16x128xf32, #tpu.memory_space<vmem>>, vector<2x16x32xf32>
    tpu.vector_store %arg15[%c0_49, %c0_50, %c96], %114 {strides = array<i32>} : memref<2x16x128xf32, #tpu.memory_space<vmem>>, vector<2x16x32xf32>,
    %c0_51 = arith.constant 0 : index
    %c0_52 = arith.constant 0 : index
    %c0_53 = arith.constant 0 : index
    %116 = vector.load %arg15[%c0_51, %c0_52, %c0_53] : memref<2x16x128xf32, #tpu.memory_space<vmem>>, vector<2x16x128xf32>
    %117 = vector.shape_cast %116 : vector<2x16x128xf32> to vector<32x128xf32>
    %118 = arith.truncf %117 : vector<32x128xf32> to vector<32x128xbf16>
    %c0_54 = arith.constant 0 : index
    %c0_55 = arith.constant 0 : index
    %119 = vector.load %arg6[%c0_54, %c0_55] : memref<128x128xbf16, #tpu.memory_space<vmem>>, vector<128x128xbf16>
    %cst_56 = arith.constant dense<0.000000e+00> : vector<32x128xf32>
    %120 = tpu.matmul %118, %119, %cst_56 {dimension_numbers = #tpu.dot_dimension_numbers<[1], [0], [0], [1], [0, 0, 1, 1], [], []>} : vector<32x128xbf16>, vector<128x128xbf16>, vector<32x128xf32> -> vector<32x128xf32>
    %121 = vector.broadcast %4 : vector<1x128xf32> to vector<32x128xf32>
    %122 = arith.addf %120, %121 : vector<32x128xf32>
    %123 = arith.addf %9, %122 : vector<32x128xf32>
    %cst_57 = arith.constant dense<0.000000e+00> : vector<32xf32>
    %124 = vector.multi_reduction <add>, %123, %cst_57 [1] : vector<32x128xf32> to vector<32xf32>
    %125 = vector.shape_cast %124 : vector<32xf32> to vector<32x1xf32>
    %cst_58 = arith.constant 1.280000e+02 : f32
    %126 = vector.broadcast %cst_58 : f32 to vector<32x1xf32>
    %127 = arith.divf %125, %126 : vector<32x1xf32>
    %128 = vector.broadcast %127 : vector<32x1xf32> to vector<32x128xf32>
    %129 = arith.subf %123, %128 : vector<32x128xf32>
    %130 = arith.mulf %129, %129 : vector<32x128xf32>
    %cst_59 = arith.constant dense<0.000000e+00> : vector<32xf32>
    %131 = vector.multi_reduction <add>, %130, %cst_59 [1] : vector<32x128xf32> to vector<32xf32>
    %132 = vector.shape_cast %131 : vector<32xf32> to vector<32x1xf32>
    %cst_60 = arith.constant 1.280000e+02 : f32
    %133 = vector.broadcast %cst_60 : f32 to vector<32x1xf32>
    %134 = arith.divf %132, %133 : vector<32x1xf32>
    %135 = vector.broadcast %127 : vector<32x1xf32> to vector<32x128xf32>
    %136 = arith.subf %123, %135 : vector<32x128xf32>
    %cst_61 = arith.constant 9.99999997E-7 : f32
    %137 = vector.broadcast %cst_61 : f32 to vector<32x1xf32>
    %138 = arith.addf %134, %137 : vector<32x1xf32>
    %139 = math.rsqrt %138 : vector<32x1xf32>
    %140 = vector.broadcast %139 : vector<32x1xf32> to vector<32x128xf32>
    %141 = arith.mulf %136, %140 : vector<32x128xf32>
    %142 = vector.broadcast %5 : vector<1x128xf32> to vector<32x128xf32>
    %143 = arith.mulf %141, %142 : vector<32x128xf32>
    %144 = vector.broadcast %6 : vector<1x128xf32> to vector<32x128xf32>
    %145 = arith.addf %143, %144 : vector<32x128xf32>
    %146 = arith.truncf %145 : vector<32x128xf32> to vector<32x128xbf16>
    %c0_62 = arith.constant 0 : index
    %c0_63 = arith.constant 0 : index
    %147 = vector.load %arg10[%c0_62, %c0_63] : memref<128x512xbf16, #tpu.memory_space<vmem>>, vector<128x512xbf16>
    %cst_64 = arith.constant dense<0.000000e+00> : vector<32x512xf32>
    %148 = tpu.matmul %146, %147, %cst_64 {dimension_numbers = #tpu.dot_dimension_numbers<[1], [0], [0], [1], [0, 0, 1, 1], [], []>} : vector<32x128xbf16>, vector<128x512xbf16>, vector<32x512xf32> -> vector<32x512xf32>
    %149 = vector.broadcast %7 : vector<1x512xf32> to vector<32x512xf32>
    %150 = arith.addf %148, %149 : vector<32x512xf32>
    %cst_65 = arith.constant 5.000000e-01 : f32
    %151 = vector.broadcast %cst_65 : f32 to vector<32x512xf32>
    %152 = arith.mulf %151, %150 : vector<32x512xf32>
    %cst_66 = arith.constant 0.707106769 : f32
    %153 = vector.broadcast %cst_66 : f32 to vector<32x512xf32>
    %154 = arith.mulf %150, %153 : vector<32x512xf32>
    %155 = math.erf %154 : vector<32x512xf32>
    %cst_67 = arith.constant 1.000000e+00 : f32
    %156 = vector.broadcast %cst_67 : f32 to vector<32x512xf32>
    %157 = arith.addf %156, %155 : vector<32x512xf32>
    %158 = arith.mulf %152, %157 : vector<32x512xf32>
    %159 = arith.truncf %158 : vector<32x512xf32> to vector<32x512xbf16>
    %c0_68 = arith.constant 0 : index
    %c0_69 = arith.constant 0 : index
    %160 = vector.load %arg12[%c0_68, %c0_69] : memref<512x128xbf16, #tpu.memory_space<vmem>>, vector<512x128xbf16>
    %cst_70 = arith.constant dense<0.000000e+00> : vector<32x128xf32>
    %161 = tpu.matmul %159, %160, %cst_70 {dimension_numbers = #tpu.dot_dimension_numbers<[1], [0], [0], [1], [0, 0, 1, 1], [], []>} : vector<32x512xbf16>, vector<512x128xbf16>, vector<32x128xf32> -> vector<32x128xf32>
    %162 = vector.broadcast %8 : vector<1x128xf32> to vector<32x128xf32>
    %163 = arith.addf %161, %162 : vector<32x128xf32>
    %164 = arith.addf %123, %163 : vector<32x128xf32>
    %165 = vector.shape_cast %164 : vector<32x128xf32> to vector<2x16x128xf32>
    %c0_71 = arith.constant 0 : index
    %c0_72 = arith.constant 0 : index
    %c0_73 = arith.constant 0 : index
    %166 = vector.load %arg14[%c0_71, %c0_72, %c0_73] : memref<2x16x128xf32, #tpu.memory_space<vmem>>, vector<2x16x128xf32>
    tpu.vector_store %arg14[%c0_71, %c0_72, %c0_73], %165 {strides = array<i32>} : memref<2x16x128xf32, #tpu.memory_space<vmem>>, vector<2x16x128xf32>,
    return
  }
  func.func @transform_0(%arg0: i32) -> (i32, i32, i32) {
    %c0_i32 = arith.constant 0 : i32
    %c0_i32_0 = arith.constant 0 : i32
    %c0_i32_1 = arith.constant 0 : i32
    return %arg0, %c0_i32, %c0_i32_0 : i32, i32, i32
  }
  func.func @transform_1(%arg0: i32) -> (i32, i32) {
    %c0_i32 = arith.constant 0 : i32
    %c0_i32_0 = arith.constant 0 : i32
    %c0_i32_1 = arith.constant 0 : i32
    return %c0_i32, %c0_i32_0 : i32, i32
  }
  func.func @transform_2(%arg0: i32) -> (i32, i32) {
    %c0_i32 = arith.constant 0 : i32
    %c0_i32_0 = arith.constant 0 : i32
    %c0_i32_1 = arith.constant 0 : i32
    return %c0_i32, %c0_i32_0 : i32, i32
  }
  func.func @transform_3(%arg0: i32) -> (i32, i32) {
    %c0_i32 = arith.constant 0 : i32
    %c0_i32_0 = arith.constant 0 : i32
    %c0_i32_1 = arith.constant 0 : i32
    return %c0_i32, %c0_i32_0 : i32, i32
  }
  func.func @transform_4(%arg0: i32) -> (i32, i32) {
    %c0_i32 = arith.constant 0 : i32
    %c0_i32_0 = arith.constant 0 : i32
    %c0_i32_1 = arith.constant 0 : i32
    return %c0_i32, %c0_i32_0 : i32, i32
  }
  func.func @transform_5(%arg0: i32) -> (i32, i32) {
    %c0_i32 = arith.constant 0 : i32
    %c0_i32_0 = arith.constant 0 : i32
    %c0_i32_1 = arith.constant 0 : i32
    return %c0_i32, %c0_i32_0 : i32, i32
  }
  func.func @transform_6(%arg0: i32) -> (i32, i32) {
    %c0_i32 = arith.constant 0 : i32
    %c0_i32_0 = arith.constant 0 : i32
    %c0_i32_1 = arith.constant 0 : i32
    return %c0_i32, %c0_i32_0 : i32, i32
  }
  func.func @transform_7(%arg0: i32) -> (i32, i32) {
    %c0_i32 = arith.constant 0 : i32
    %c0_i32_0 = arith.constant 0 : i32
    %c0_i32_1 = arith.constant 0 : i32
    return %c0_i32, %c0_i32_0 : i32, i32
  }
  func.func @transform_8(%arg0: i32) -> (i32, i32) {
    %c0_i32 = arith.constant 0 : i32
    %c0_i32_0 = arith.constant 0 : i32
    %c0_i32_1 = arith.constant 0 : i32
    return %c0_i32, %c0_i32_0 : i32, i32
  }
  func.func @transform_9(%arg0: i32) -> (i32, i32) {
    %c0_i32 = arith.constant 0 : i32
    %c0_i32_0 = arith.constant 0 : i32
    %c0_i32_1 = arith.constant 0 : i32
    return %c0_i32, %c0_i32_0 : i32, i32
  }
  func.func @transform_10(%arg0: i32) -> (i32, i32) {
    %c0_i32 = arith.constant 0 : i32
    %c0_i32_0 = arith.constant 0 : i32
    %c0_i32_1 = arith.constant 0 : i32
    return %c0_i32, %c0_i32_0 : i32, i32
  }
  func.func @transform_11(%arg0: i32) -> (i32, i32) {
    %c0_i32 = arith.constant 0 : i32
    %c0_i32_0 = arith.constant 0 : i32
    %c0_i32_1 = arith.constant 0 : i32
    return %c0_i32, %c0_i32_0 : i32, i32
  }
  func.func @transform_12(%arg0: i32) -> (i32, i32) {
    %c0_i32 = arith.constant 0 : i32
    %c0_i32_0 = arith.constant 0 : i32
    %c0_i32_1 = arith.constant 0 : i32
    return %c0_i32, %c0_i32_0 : i32, i32
  }
  func.func @transform_13(%arg0: i32) -> (i32, i32, i32) {
    %c0_i32 = arith.constant 0 : i32
    %c0_i32_0 = arith.constant 0 : i32
    %c0_i32_1 = arith.constant 0 : i32
    return %arg0, %c0_i32, %c0_i32_0 : i32, i32, i32
  }
}

</mosaic_0001>

<bundles_post_ra>
// kernel: tpu_custom_call.1
= control target key start
LH: loop header
LB: loop body
LE: loop exit
PB: predicated region body
PF: predicated region fallthrough
CT: control target
= control target key end

     0   :  { %s5352_s0 = inlined_call_operand.hbm [shape: f32[4,16,128], index: 0, kind: input, shape index: {}]   ;;  %s5353_s1 = inlined_call_operand.hbm [shape: f32[1,128], index: 1, kind: input, shape index: {}]   ;;  %s5354_s2 = inlined_call_operand.hbm [shape: f32[1,128], index: 2, kind: input, shape index: {}]   ;;  %s5355_s3 = inlined_call_operand.hbm [shape: bf16[128,384], index: 3, kind: input, shape index: {}]   ;;  %s5356_s4 = inlined_call_operand.hbm [shape: f32[1,384], index: 4, kind: input, shape index: {}]   ;;  %s5357_s5 = inlined_call_operand.hbm [shape: bf16[128,128], index: 5, kind: input, shape index: {}]   ;;  %s5358_s6 = inlined_call_operand.hbm [shape: f32[1,128], index: 6, kind: input, shape index: {}]   ;;  %s5359_s7 = inlined_call_operand.hbm [shape: f32[1,128], index: 7, kind: input, shape index: {}]   ;;  %s5360_s8 = inlined_call_operand.hbm [shape: f32[1,128], index: 8, kind: input, shape index: {}]   ;;  %s5361_s9 = inlined_call_operand.hbm [shape: bf16[128,512], index: 9, kind: input, shape index: {}]   ;;  %s5362_s10 = inlined_call_operand.hbm [shape: f32[1,512], index: 10, kind: input, shape index: {}]   ;;  %s5363_s11 = inlined_call_operand.hbm [shape: bf16[512,128], index: 11, kind: input, shape index: {}]   ;;  %s5364_s12 = inlined_call_operand.hbm [shape: f32[1,128], index: 12, kind: input, shape index: {}]   ;;  %s5365_s13 = inlined_call_operand.hbm [shape: f32[4,16,128], index: 13, kind: output, shape index: {}]  }
   0x1   :  { %5377 = sst [smem:[#allocation36_spill]] %s5352_s0 }
   0x2   :  { %5378 = sst [smem:[#allocation37_spill]] %s5353_s1 }
   0x3   :  { %5379 = sst [smem:[#allocation38_spill]] %s5355_s3 }
   0x4   :  { %5380 = sst [smem:[#allocation39_spill]] %s5365_s13 }
   0x5   :  { %18 = vsyncpa [#allocation4], 0 }
   0x6   :  { %20 = vsyncpa [#allocation4 + $0x1], 0 }
   0x7   :  { %21 = vsyncpa [#allocation7], 0 }
   0x8   :  { %22 = vsyncpa [#allocation10], 0 }
   0x9   :  { %23 = vsyncpa [#allocation13], 0 }
   0xa   :  { %24 = vsyncpa [#allocation16], 0 }
   0xb   :  { %25 = vsyncpa [#allocation19], 0 }
   0xc   :  { %26 = vsyncpa [#allocation22], 0 }
   0xd   :  { %27 = vsyncpa [#allocation5], 0 }
   0xe   :  { %29 = vsyncpa [#allocation5 + $0x1], 0  ;;  %s4572_s25 = smov 0   ;;  %s4574_s26 = smov 0  }
   0xf   :  { %s4576_s27 = smov 0   ;;  %s4578_s28 = smov 0  }
  0x10 LB: > { %5381 = sst [smem:[#allocation33_spill]] %s4458_s25  ;;  %s4472_s29 = smov [#allocation6]   ;;  %s4470_s28 = sphi %s4578_s28, %s5423_s28   ;;  %s4466_s27 = sphi %s4576_s27, %s5422_s27   ;;  %s4462_s26 = sphi %s4574_s26, %s5421_s26   ;;  %s4458_s25 = sphi %s4572_s25, %s5420_s25  }
  0x11   : > { %s357_s30 = sshll.u32 %s4472_s29, 4  ;;  %s4593_s14 = sadd.s32 4294967295, %s4470_s28   ;;  %s4598_s30 = int_to_ptr.vmem [resolvable:$true] %s357_s30 }
  0x12   : > { %5382 = sst [smem:[#allocation34_spill]] %s4593_s14  ;;  %p3190_p0 = scmp.ge.s32.totalorder %s4470_s28, 1 }
  0x13   : > { %p5372_p1 = scmp.eq.s32.totalorder %s4593_s14, 0  ;;  %p344_p2 = scmp.lt.s32.totalorder %s4470_s28, 3 }
  0x14   : > { %s4473_s16 = smov [#allocation9]   ;;  %s4474_s19 = smov [#allocation12]  }
  0x15   : > { %p4600_p3 = pnand %p3190_p0, %p344_p2  ;;  %s378_s17 = sshll.u32 %s4473_s16, 4  ;;  %s4607_s17 = int_to_ptr.vmem [resolvable:$true] %s378_s17 }
  0x16   : > { %s402_s20 = sshll.u32 %s4474_s19, 4  ;;  %s5386_s1 = sld [smem:[#allocation37_spill]]  ;;  %s4615_s20 = int_to_ptr.vmem [resolvable:$true] %s402_s20 }
  0x17   : > { %s5383_s15 = scalar_select %p4600_p3, 1, 0 }
  0x18   : > { %p3647_p5 = pneg %p4600_p3 }
  0x19   : > { %5384 = sst [smem:[#allocation35_spill]] %s5383_s15 }
  0x1a   : > { %p4611_p6 = pnand %p3647_p5, %p5372_p1 }
  0x1c   : > { %s4014_s23 = scalar_lea.hbm %s5386_s1, 16  ;;  %p4625_p8 = pneg %p4611_p6 }
  0x1d   : > { %p4015_p7 = scmp.ne.s32.totalorder %s5386_s1, %s4014_s23  ;;  %p4021_p11 = scmp.lt.u32.totalorder %s4014_s23, %s5386_s1 }
  0x1f   : > { %p4017_p9 = pnand %p4625_p8, %p4015_p7 }
  0x21   : > { %p4018_p10 = pneg %p4017_p9 }
  0x23   : > { %p4023_p12 = pnand %p4021_p11, %p4018_p10 }
  0x25   : > { %4026 = shalt.err (!%p4023_p12)
}
  0x26   : > { %s4027_s21 = scalar_lea.vmem %s4598_s30, 16  ;;  %s4034_s22 = scalar_lea.vmem %s4598_s30, 32 }
  0x27   : > { %p4028_p13 = scmp.ne.s32.totalorder %s4598_s30, %s4027_s21  ;;  %p4035_p5 = scmp.lt.s32.totalorder %s4598_s30, %s4598_s30 }
  0x28   : > { %p4036_p7 = scmp.lt.s32.totalorder %s4034_s22, %s4027_s21 }
  0x29   : > { %p4030_p0 = pnand %p4028_p13, %p4625_p8 }
  0x2a   : > { %p4037_p9 = por %p4036_p7, %p4035_p5 }
  0x2b   : > { %p4031_p2 = pneg %p4030_p0 }
  0x2d   : > { %p4038_p4 = pnand %p4037_p9, %p4031_p2 }
  0x2f   : > { %4041 = shalt.err (!%p4038_p4)
}
  0x30   : > { %3650 = dma.hbm_to_vmem [thread:$0]  (!%p4611_p6), %s5386_s1, 16, %s4598_s30, [#allocation7]  }
  0x31   : > { %s5388_s3 = sld [smem:[#allocation38_spill]] }
  0x37   : > { %s4042_s19 = scalar_lea.hbm %s5388_s3, 3072 }
  0x38   : > { %p4043_p10 = scmp.ne.s32.totalorder %s5388_s3, %s4042_s19  ;;  %p4049_p4 = scmp.lt.u32.totalorder %s4042_s19, %s5388_s3 }
  0x3a   : > { %p4045_p11 = pnand %p4043_p10, %p4625_p8 }
  0x3c   : > { %p4046_p12 = pneg %p4045_p11 }
  0x3e   : > { %p4051_p13 = pnand %p4049_p4, %p4046_p12 }
  0x40   : > { %4054 = shalt.err (!%p4051_p13)
}
  0x41   : > { %s4055_s30 = scalar_lea.vmem %s4607_s17, 3072  ;;  %p4063_p7 = scmp.lt.s32.totalorder %s4607_s17, %s4607_s17 }
  0x42   : > { %p4056_p0 = scmp.ne.s32.totalorder %s4607_s17, %s4055_s30  ;;  %p4064_p9 = scmp.lt.s32.totalorder %s4055_s30, %s4055_s30 }
  0x44   : > { %p4058_p2 = pnand %p4056_p0, %p4625_p8  ;;  %p4065_p10 = por %p4064_p9, %p4063_p7 }
  0x46   : > { %p4059_p5 = pneg %p4058_p2 }
  0x48   : > { %p4066_p11 = pnand %p4065_p10, %p4059_p5 }
  0x4a   : > { %4069 = shalt.err (!%p4066_p11)
}
  0x4b   : > { %s4475_s0 = smov 192   ;;  %s4476_s15 = smov 12  }
  0x4c   : > { %3656 = dma.hbm_to_vmem [thread:$0]  (!%p4611_p6), %s5388_s3, 3072, %s4607_s17, [#allocation10], %s4475_s0, %s4475_s0, %s4476_s15  }
  0x4d   : > { %s4070_s19 = scalar_lea.hbm %s5357_s5, 1024 }
  0x4e   : > { %p4071_p12 = scmp.ne.s32.totalorder %s5357_s5, %s4070_s19  ;;  %p4077_p0 = scmp.lt.u32.totalorder %s4070_s19, %s5357_s5 }
  0x50   : > { %p4073_p4 = pnand %p4071_p12, %p4625_p8 }
  0x52   : > { %p4074_p13 = pneg %p4073_p4 }
  0x54   : > { %p4079_p2 = pnand %p4077_p0, %p4074_p13 }
  0x56   : > { %4082 = shalt.err (!%p4079_p2)
}
  0x57   : > { %s4083_s17 = scalar_lea.vmem %s4615_s20, 1024  ;;  %p4091_p10 = scmp.lt.s32.totalorder %s4615_s20, %s4615_s20 }
  0x58   : > { %p4084_p5 = scmp.ne.s32.totalorder %s4615_s20, %s4083_s17  ;;  %p4092_p11 = scmp.lt.s32.totalorder %s4083_s17, %s4083_s17 }
  0x5a   : > { %p4086_p7 = pnand %p4084_p5, %p4625_p8  ;;  %p4093_p12 = por %p4092_p11, %p4091_p10 }
  0x5c   : > { %p4087_p9 = pneg %p4086_p7 }
  0x5e   : > { %p4094_p4 = pnand %p4093_p12, %p4087_p9 }
  0x60   : > { %4097 = shalt.err (!%p4094_p4)
}
  0x61   : > { %s5374_s0 = smov 64   ;;  %s5375_s1 = smov 4  }
  0x62   : > { %3662 = dma.hbm_to_vmem [thread:$0]  (!%p4611_p6), %s5357_s5, 1024, %s4615_s20, [#allocation13], %s5374_s0, %s5374_s0, %s5375_s1  }
  0x63   : > { %s4479_s23 = smov [#allocation15]   ;;  %s4480_s29 = smov [#allocation18]  }
  0x64   : > { %s427_s24 = sshll.u32 %s4479_s23, 4  ;;  %s448_s19 = sshll.u32 %s4480_s29, 4  ;;  %s428_s24 = int_to_ptr.vmem [resolvable:$true] %s427_s24  ;;  %s449_s19 = int_to_ptr.vmem [resolvable:$true] %s448_s19 }
  0x65   : > { %s4098_s30 = scalar_lea.hbm %s5359_s7, 16 }
  0x66   : > { %p4099_p13 = scmp.ne.s32.totalorder %s5359_s7, %s4098_s30  ;;  %p4105_p5 = scmp.lt.u32.totalorder %s4098_s30, %s5359_s7 }
  0x68   : > { %p4101_p0 = pnand %p4099_p13, %p4625_p8 }
  0x6a   : > { %p4102_p2 = pneg %p4101_p0 }
  0x6c   : > { %p4107_p7 = pnand %p4105_p5, %p4102_p2 }
  0x6e   : > { %4110 = shalt.err (!%p4107_p7)
}
  0x6f   : > { %s4111_s20 = scalar_lea.vmem %s428_s24, 16  ;;  %s4118_s15 = scalar_lea.vmem %s428_s24, 32 }
  0x70   : > { %p4112_p9 = scmp.ne.s32.totalorder %s428_s24, %s4111_s20  ;;  %p4119_p12 = scmp.lt.s32.totalorder %s428_s24, %s428_s24 }
  0x71   : > { %p4120_p4 = scmp.lt.s32.totalorder %s4118_s15, %s4111_s20 }
  0x72   : > { %p4114_p10 = pnand %p4112_p9, %p4625_p8 }
  0x73   : > { %p4121_p1 = por %p4120_p4, %p4119_p12 }
  0x74   : > { %p4115_p11 = pneg %p4114_p10 }
  0x76   : > { %p4122_p3 = pnand %p4121_p1, %p4115_p11 }
  0x78   : > { %4125 = shalt.err (!%p4122_p3)
}
  0x79   : > { %3668 = dma.hbm_to_vmem [thread:$0]  (!%p4611_p6), %s5359_s7, 16, %s428_s24, [#allocation16]  }
  0x7a   : > { %s4126_s23 = scalar_lea.hbm %s5361_s9, 4096 }
  0x7b   : > { %p4127_p13 = scmp.ne.s32.totalorder %s5361_s9, %s4126_s23  ;;  %p4133_p3 = scmp.lt.u32.totalorder %s4126_s23, %s5361_s9 }
  0x7d   : > { %p4129_p0 = pnand %p4127_p13, %p4625_p8 }
  0x7f   : > { %p4130_p1 = pneg %p4129_p0 }
  0x81   : > { %p4135_p2 = pnand %p4133_p3, %p4130_p1 }
  0x83   : > { %4138 = shalt.err (!%p4135_p2)
}
  0x84   : > { %s4139_s17 = scalar_lea.vmem %s449_s19, 4096  ;;  %p4147_p10 = scmp.lt.s32.totalorder %s449_s19, %s449_s19 }
  0x85   : > { %p4140_p5 = scmp.ne.s32.totalorder %s449_s19, %s4139_s17  ;;  %p4148_p11 = scmp.lt.s32.totalorder %s4139_s17, %s4139_s17 }
  0x87   : > { %p4142_p7 = pnand %p4140_p5, %p4625_p8  ;;  %p4149_p12 = por %p4148_p11, %p4147_p10 }
  0x89   : > { %p4143_p9 = pneg %p4142_p7 }
  0x8b   : > { %p4150_p4 = pnand %p4149_p12, %p4143_p9 }
  0x8d   : > { %4153 = shalt.err (!%p4150_p4)
}
  0x8e   : > { %s4481_s24 = smov 256   ;;  %s4482_s20 = smov 16  }
  0x8f   : > { %3674 = dma.hbm_to_vmem [thread:$0]  (!%p4611_p6), %s5361_s9, 4096, %s449_s19, [#allocation19], %s4481_s24, %s4481_s24, %s4482_s20  }
  0x90   : > { %s4483_s13 = smov [#allocation21]   ;;  %s4484_s14 = smov [#allocation8]  }
  0x91   : > { %s472_s25 = sshll.u32 %s4483_s13, 4  ;;  %s368_s23 = sshll.u32 %s4484_s14, 4  ;;  %s473_s25 = int_to_ptr.vmem [resolvable:$true] %s472_s25  ;;  %s369_s23 = int_to_ptr.vmem [resolvable:$true] %s368_s23 }
  0x92   : > { %s4154_s22 = scalar_lea.hbm %s5363_s11, 4096 }
  0x93   : > { %p4155_p13 = scmp.ne.s32.totalorder %s5363_s11, %s4154_s22  ;;  %p4161_p3 = scmp.lt.u32.totalorder %s4154_s22, %s5363_s11 }
  0x95   : > { %p4157_p0 = pnand %p4155_p13, %p4625_p8 }
  0x97   : > { %p4158_p1 = pneg %p4157_p0 }
  0x99   : > { %p4163_p2 = pnand %p4161_p3, %p4158_p1 }
  0x9b   : > { %4166 = shalt.err (!%p4163_p2)
}
  0x9c   : > { %s4167_s19 = scalar_lea.vmem %s473_s25, 4096  ;;  %p4175_p10 = scmp.lt.s32.totalorder %s473_s25, %s473_s25 }
  0x9d   : > { %p4168_p5 = scmp.ne.s32.totalorder %s473_s25, %s4167_s19  ;;  %p4176_p11 = scmp.lt.s32.totalorder %s4167_s19, %s4167_s19 }
  0x9f   : > { %p4170_p7 = pnand %p4168_p5, %p4625_p8  ;;  %p4177_p12 = por %p4176_p11, %p4175_p10 }
  0xa1   : > { %p4171_p9 = pneg %p4170_p7 }
  0xa3   : > { %p4178_p4 = pnand %p4177_p12, %p4171_p9 }
  0xa5   : > { %4181 = shalt.err (!%p4178_p4)
}
  0xa6   : > { %s5389_s24 = smov 4   ;;  %s5390_s20 = smov 64  }
  0xa7   : > { %3680 = dma.hbm_to_vmem [thread:$0]  (!%p4611_p6), %s5363_s11, 4096, %s473_s25, [#allocation22], %s5390_s20, %s5390_s20, %s5389_s24  }
  0xa8   : > { %s4182_s13 = scalar_lea.hbm %s5354_s2, 16 }
  0xa9   : > { %p4183_p13 = scmp.ne.s32.totalorder %s5354_s2, %s4182_s13  ;;  %p4189_p3 = scmp.lt.u32.totalorder %s4182_s13, %s5354_s2 }
  0xab   : > { %p4185_p0 = pnand %p4183_p13, %p4625_p8 }
  0xad   : > { %p4186_p1 = pneg %p4185_p0 }
  0xaf   : > { %p4191_p2 = pnand %p4189_p3, %p4186_p1 }
  0xb1   : > { %4194 = shalt.err (!%p4191_p2)
}
  0xb2   : > { %s4195_s30 = scalar_lea.vmem %s369_s23, 16  ;;  %s4202_s25 = scalar_lea.vmem %s369_s23, 32 }
  0xb3   : > { %p4196_p5 = scmp.ne.s32.totalorder %s369_s23, %s4195_s30  ;;  %p4203_p10 = scmp.lt.s32.totalorder %s369_s23, %s369_s23 }
  0xb4   : > { %p4204_p11 = scmp.lt.s32.totalorder %s4202_s25, %s4195_s30 }
  0xb5   : > { %p4198_p7 = pnand %p4196_p5, %p4625_p8 }
  0xb6   : > { %p4205_p12 = por %p4204_p11, %p4203_p10 }
  0xb7   : > { %p4199_p9 = pneg %p4198_p7 }
  0xb9   : > { %p4206_p4 = pnand %p4205_p12, %p4199_p9 }
  0xbb   : > { %4209 = shalt.err (!%p4206_p4)
}
  0xbc   : > { %3653 = dma.hbm_to_vmem [thread:$0]  (!%p4611_p6), %s5354_s2, 16, %s369_s23, [#allocation7]  }
  0xbd   : > { %s4485_s24 = smov [#allocation11]   ;;  %s4486_s0 = smov [#allocation14]  }
  0xbe   : > { %s392_s20 = sshll.u32 %s4485_s24, 4  ;;  %s416_s1 = sshll.u32 %s4486_s0, 4  ;;  %s393_s20 = int_to_ptr.vmem [resolvable:$true] %s392_s20  ;;  %s417_s1 = int_to_ptr.vmem [resolvable:$true] %s416_s1 }
  0xbf   : > { %s4210_s13 = scalar_lea.hbm %s5356_s4, 48 }
  0xc0   : > { %p4211_p13 = scmp.ne.s32.totalorder %s5356_s4, %s4210_s13  ;;  %p4217_p3 = scmp.lt.u32.totalorder %s4210_s13, %s5356_s4 }
  0xc2   : > { %p4213_p0 = pnand %p4211_p13, %p4625_p8 }
  0xc4   : > { %p4214_p1 = pneg %p4213_p0 }
  0xc6   : > { %p4219_p2 = pnand %p4217_p3, %p4214_p1 }
  0xc8   : > { %4222 = shalt.err (!%p4219_p2)
}
  0xc9   : > { %s4223_s23 = scalar_lea.vmem %s393_s20, 48  ;;  %s4230_s30 = scalar_lea.vmem %s393_s20, 64 }
  0xca   : > { %p4224_p5 = scmp.ne.s32.totalorder %s393_s20, %s4223_s23  ;;  %p4231_p10 = scmp.lt.s32.totalorder %s393_s20, %s393_s20 }
  0xcb   : > { %p4232_p11 = scmp.lt.s32.totalorder %s4230_s30, %s4223_s23 }
  0xcc   : > { %p4226_p7 = pnand %p4224_p5, %p4625_p8 }
  0xcd   : > { %p4233_p12 = por %p4232_p11, %p4231_p10 }
  0xce   : > { %p4227_p9 = pneg %p4226_p7 }
  0xd0   : > { %p4234_p4 = pnand %p4233_p12, %p4227_p9 }
  0xd2   : > { %4237 = shalt.err (!%p4234_p4)
}
  0xd3   : > { %3659 = dma.hbm_to_vmem [thread:$0]  (!%p4611_p6), %s5356_s4, 48, %s393_s20, [#allocation10]  }
  0xd4   : > { %s4238_s0 = scalar_lea.hbm %s5358_s6, 16 }
  0xd5   : > { %p4239_p13 = scmp.ne.s32.totalorder %s5358_s6, %s4238_s0  ;;  %p4245_p3 = scmp.lt.u32.totalorder %s4238_s0, %s5358_s6 }
  0xd7   : > { %p4241_p0 = pnand %p4239_p13, %p4625_p8 }
  0xd9   : > { %p4242_p1 = pneg %p4241_p0 }
  0xdb   : > { %p4247_p2 = pnand %p4245_p3, %p4242_p1 }
  0xdd   : > { %4250 = shalt.err (!%p4247_p2)
}
  0xde   : > { %s4251_s29 = scalar_lea.vmem %s417_s1, 16  ;;  %s4258_s20 = scalar_lea.vmem %s417_s1, 32 }
  0xdf   : > { %p4252_p5 = scmp.ne.s32.totalorder %s417_s1, %s4251_s29  ;;  %p4259_p10 = scmp.lt.s32.totalorder %s417_s1, %s417_s1 }
  0xe0   : > { %p4260_p11 = scmp.lt.s32.totalorder %s4258_s20, %s4251_s29 }
  0xe1   : > { %p4254_p7 = pnand %p4252_p5, %p4625_p8 }
  0xe2   : > { %p4261_p12 = por %p4260_p11, %p4259_p10 }
  0xe3   : > { %p4255_p9 = pneg %p4254_p7 }
  0xe5   : > { %p4262_p4 = pnand %p4261_p12, %p4255_p9 }
  0xe7   : > { %4265 = shalt.err (!%p4262_p4)
}
  0xe8   : > { %3665 = dma.hbm_to_vmem [thread:$0]  (!%p4611_p6), %s5358_s6, 16, %s417_s1, [#allocation13]  }
  0xe9   : > { %s4487_s23 = smov [#allocation17]   ;;  %s4488_s25 = smov [#allocation20]  }
  0xea   : > { %s438_s30 = sshll.u32 %s4487_s23, 4  ;;  %s462_s17 = sshll.u32 %s4488_s25, 4  ;;  %s439_s30 = int_to_ptr.vmem [resolvable:$true] %s438_s30  ;;  %s463_s17 = int_to_ptr.vmem [resolvable:$true] %s462_s17 }
  0xeb   : > { %s4266_s0 = scalar_lea.hbm %s5360_s8, 16 }
  0xec   : > { %p4267_p13 = scmp.ne.s32.totalorder %s5360_s8, %s4266_s0  ;;  %p4273_p3 = scmp.lt.u32.totalorder %s4266_s0, %s5360_s8 }
  0xee   : > { %p4269_p0 = pnand %p4267_p13, %p4625_p8 }
  0xf0   : > { %p4270_p1 = pneg %p4269_p0 }
  0xf2   : > { %p4275_p2 = pnand %p4273_p3, %p4270_p1 }
  0xf4   : > { %4278 = shalt.err (!%p4275_p2)
}
  0xf5   : > { %s4279_s1 = scalar_lea.vmem %s439_s30, 16  ;;  %s4286_s29 = scalar_lea.vmem %s439_s30, 32 }
  0xf6   : > { %p4280_p5 = scmp.ne.s32.totalorder %s439_s30, %s4279_s1  ;;  %p4287_p10 = scmp.lt.s32.totalorder %s439_s30, %s439_s30 }
  0xf7   : > { %p4288_p11 = scmp.lt.s32.totalorder %s4286_s29, %s4279_s1 }
  0xf8   : > { %p4282_p7 = pnand %p4280_p5, %p4625_p8 }
  0xf9   : > { %p4289_p12 = por %p4288_p11, %p4287_p10 }
  0xfa   : > { %p4283_p9 = pneg %p4282_p7 }
  0xfc   : > { %p4290_p4 = pnand %p4289_p12, %p4283_p9 }
  0xfe   : > { %4293 = shalt.err (!%p4290_p4)
}
  0xff   : > { %3671 = dma.hbm_to_vmem [thread:$0]  (!%p4611_p6), %s5360_s8, 16, %s439_s30, [#allocation16]  }
 0x100   : > { %s4294_s25 = scalar_lea.hbm %s5362_s10, 64 }
 0x101   : > { %p4295_p13 = scmp.ne.s32.totalorder %s5362_s10, %s4294_s25  ;;  %p4301_p3 = scmp.lt.u32.totalorder %s4294_s25, %s5362_s10 }
 0x103   : > { %p4297_p0 = pnand %p4295_p13, %p4625_p8 }
 0x105   : > { %p4298_p1 = pneg %p4297_p0 }
 0x107   : > { %p4303_p2 = pnand %p4301_p3, %p4298_p1 }
 0x109   : > { %4306 = shalt.err (!%p4303_p2)
}
 0x10a   : > { %s4307_s3 = scalar_lea.vmem %s463_s17, 64  ;;  %p4315_p10 = scmp.lt.s32.totalorder %s463_s17, %s463_s17 }
 0x10b   : > { %p4308_p5 = scmp.ne.s32.totalorder %s463_s17, %s4307_s3  ;;  %p4316_p11 = scmp.lt.s32.totalorder %s4307_s3, %s4307_s3 }
 0x10d   : > { %p4310_p7 = pnand %p4308_p5, %p4625_p8  ;;  %p4317_p12 = por %p4316_p11, %p4315_p10 }
 0x10f   : > { %p4311_p9 = pneg %p4310_p7 }
 0x111   : > { %p4318_p4 = pnand %p4317_p12, %p4311_p9 }
 0x113   : > { %4321 = shalt.err (!%p4318_p4)
}
 0x114   : > { %3677 = dma.hbm_to_vmem [thread:$0]  (!%p4611_p6), %s5362_s10, 64, %s463_s17, [#allocation19]  }
 0x115   : > { %s4489_s14 = smov [#allocation23]   ;;  %s4322_s21 = scalar_lea.hbm %s5364_s12, 16 }
 0x116   : > { %s486_s1 = sshll.u32 %s4489_s14, 4  ;;  %p4323_p13 = scmp.ne.s32.totalorder %s5364_s12, %s4322_s21  ;;  %s487_s1 = int_to_ptr.vmem [resolvable:$true] %s486_s1 }
 0x117   : > { %p4329_p3 = scmp.lt.u32.totalorder %s4322_s21, %s5364_s12 }
 0x118   : > { %p4325_p0 = pnand %p4323_p13, %p4625_p8 }
 0x11a   : > { %p4326_p1 = pneg %p4325_p0 }
 0x11c   : > { %p4331_p2 = pnand %p4329_p3, %p4326_p1 }
 0x11e   : > { %4334 = shalt.err (!%p4331_p2)
}
 0x11f   : > { %s4335_s17 = scalar_lea.vmem %s487_s1, 16  ;;  %s4342_s24 = scalar_lea.vmem %s487_s1, 32 }
 0x120   : > { %p4336_p5 = scmp.ne.s32.totalorder %s487_s1, %s4335_s17  ;;  %p4343_p10 = scmp.lt.s32.totalorder %s487_s1, %s487_s1 }
 0x121   : > { %p4344_p11 = scmp.lt.s32.totalorder %s4342_s24, %s4335_s17 }
 0x122   : > { %p4338_p7 = pnand %p4336_p5, %p4625_p8 }
 0x123   : > { %p4345_p12 = por %p4344_p11, %p4343_p10 }
 0x124   : > { %p4339_p9 = pneg %p4338_p7 }
 0x126   : > { %p4346_p4 = pnand %p4345_p12, %p4339_p9 }
 0x128   : > { %4349 = shalt.err (!%p4346_p4)
}
 0x129   : > { %s5391_s16 = sld [smem:[#allocation33_spill]]  ;;  %s5392_s3 = sld [smem:[#allocation34_spill]] }
 0x12a   : > { %3683 = dma.hbm_to_vmem [thread:$0]  (!%p4611_p6), %s5364_s12, 16, %s487_s1, [#allocation22]  }
 0x12b   : > { %s3189_s30 = sadd.s32 4294967294, %s4470_s28   ;;  %s4863_s18 = sadd.s32 1, %s4470_s28  }
 0x12c   : > { %s39_s13 = ssub.s32 %s4470_s28, %s4863_s18  ;;  %s42_s14 = sadd.s32 1, %s4466_s27 }
 0x12d   : > { %p40_p8 = scmp.eq.s32.totalorder %s39_s13, 0  ;;  %p49_p13 = scmp.ne.s32.totalorder %s4466_s27, %s4462_s26 }
 0x12e   : > { %p50_p0 = scmp.eq.s32.totalorder %s4470_s28, 0  ;;  %p337_p7 = scmp.eq.s32.totalorder %s3189_s30, 1 }
 0x12f   : > { %p55_p1 = scmp.ne.s32.totalorder %s4462_s26, %s5391_s16  ;;  %p5394_p2 = scmp.eq.s32.totalorder %s5392_s3, 0 }
 0x130   : > { %s4874_s29 = scalar_select %p40_p8, %s4466_s27, %s42_s14  }
 0x131   : > { %p4876_p3 = por %p50_p0, %p49_p13  ;;  %p4882_p6 = por %p5394_p2, %p55_p1 }
 0x132   : > { %p331_p5 = scmp.eq.s32.totalorder %s5392_s3, 1  ;;  %p3704_p9 = scmp.lt.s32.totalorder %s4470_s28, 2 }
 0x133   : > { %s497_s21 = sand.u32 1, %s4466_s27   ;;  %p4893_p11 = por %p337_p7, %p55_p1 }
 0x134   : > { %p4889_p10 = por %p331_p5, %p49_p13  ;;  %s3204_s25 = sshll.u32 %s497_s21, 5 }
 0x135   : > { %s5397_s23 = scalar_select %p4893_p11, 1, 0 }
 0x136   : > { %s5396_s22 = scalar_select %p4889_p10, 1, 0 }
 0x137   : > { %s3348_s19 = sshll.u32 %s4470_s28, 9  ;;  %s5398_s0 = sld [smem:[#allocation36_spill]] }
 0x138   : > { %s501_s16 = scalar_lea.vmem [#allocation3], %s3204_s25  ;;  %p4907_p12 = pnand %p3704_p9, %p4876_p3 }
 0x139   : > { %s509_s3 = sshll.u32 %s501_s16, 4  ;;  %s4911_s13 = scalar_lea.sflag [#allocation4], %s497_s21  ;;  %s4903_s3 = int_to_ptr.vmem [resolvable:$true] %s509_s3 }
 0x13a   : > { %p4352_p8 = pneg %p4907_p12 }
 0x13d   : > { %s4901_s15 = scalar_lea.hbm %s5398_s0, %s3348_s19  ;;  %s4355_s20 = scalar_lea.hbm %s5398_s0, 1024 }
 0x13e   : > { %s4350_s14 = scalar_lea.hbm %s4901_s15, 512  ;;  %p4356_p1 = scmp.lt.u32.totalorder %s4901_s15, %s5398_s0 }
 0x13f   : > { %p4351_p4 = scmp.ne.s32.totalorder %s4901_s15, %s4350_s14  ;;  %p4357_p3 = scmp.lt.u32.totalorder %s4355_s20, %s4350_s14 }
 0x140   : > { %p4359_p5 = scmp.lt.u32.totalorder %s4350_s14, %s4901_s15 }
 0x141   : > { %p4353_p13 = pnand %p4352_p8, %p4351_p4  ;;  %p4358_p2 = por %p4357_p3, %p4356_p1 }
 0x143   : > { %p4354_p0 = pneg %p4353_p13  ;;  %p4360_p7 = por %p4359_p5, %p4358_p2 }
 0x145   : > { %p4361_p9 = pnand %p4360_p7, %p4354_p0 }
 0x147   : > { %4364 = shalt.err (!%p4361_p9)
}
 0x148   : > { %s4365_s21 = scalar_lea.vmem %s4903_s3, 512  ;;  %s4490_s16 = smov [#allocation3]  }
 0x149   : > { %p4366_p4 = scmp.ne.s32.totalorder %s4903_s3, %s4365_s21  ;;  %s4370_s25 = sshll.u32 %s4490_s16, 4  ;;  %s4371_s25 = int_to_ptr.vmem [resolvable:$false] %s4370_s25 }
 0x14a   : > { %s4372_s19 = scalar_lea.vmem %s4371_s25, 1024  ;;  %p4373_p10 = scmp.lt.s32.totalorder %s4903_s3, %s4371_s25 }
 0x14b   : > { %p4368_p13 = pnand %p4366_p4, %p4352_p8  ;;  %p4374_p1 = scmp.lt.s32.totalorder %s4372_s19, %s4365_s21 }
 0x14d   : > { %p4369_p11 = pneg %p4368_p13  ;;  %p4375_p3 = por %p4374_p1, %p4373_p10 }
 0x14f   : > { %p4376_p2 = pnand %p4375_p3, %p4369_p11 }
 0x151   : > { %4379 = shalt.err (!%p4376_p2)
}
 0x152   : > { %s4491_s14 = smov 128   ;;  %s4492_s20 = smov 8  }
 0x153   : > { %3687 = dma.hbm_to_vmem [thread:$0]  (!%p4907_p12), %s4901_s15, 512, %s4903_s3, %s4911_s13, %s4491_s14, %s4491_s14, %s4492_s20  }
 0x154   : > { %s5400_s17 = sld [smem:[#allocation35_spill]] }
 0x15a   : > { %p5401_p8 = scmp.ne.s32.totalorder %s5400_s17, 0 }
 0x15b   : > { %s4942_s24 = sand.u32 (!%p5401_p8), 1, %s4462_s26  }
 0x15c   : > { %521 = sbr.rel (%p5401_p8) target bundleno = 4534 (0x11b6), region = 72  ;;  %s3209_s21 = sshll.u32 (!%p5401_p8), %s4942_s24, 5 }
 0x15d   : > { %s524_s16 = scalar_lea.sflag (!%p5401_p8), [#allocation4], %s4942_s24  ;;  %s4948_s25 = scalar_lea.vmem (!%p5401_p8), [#allocation3], %s3209_s21 }
 0x163   : > { %4425 = dma.done.wait (%p4882_p6), %s524_s16, 512  }
 0x164   : > { %4427 = vsyncadd (%p4882_p6), %s524_s16, 4294966784  ;;  %s5402_s15 = sld [smem:[#allocation34_spill]] }
 0x16a   : > { %p5403_p10 = scmp.eq.s32.totalorder %s5402_s15, 0 }
 0x16c   : > { %4429 = dma.done.wait (%p5403_p10), [#allocation7], 32   ;;  %p5404_p11 = pmov %p5403_p10 }
 0x16d   : > { %p5405_p12 = pmov %p5403_p10 }
 0x16e   : > { %4431 = vsyncadd (%p5404_p11), [#allocation7], 4294967264 }
 0x16f   : > { %4433 = dma.done.wait (%p5405_p12), [#allocation10], 3120   ;;  %p5406_p0 = pmov %p5403_p10 }
 0x171   : > { %4435 = vsyncadd (%p5406_p0), [#allocation10], 4294964176  ;;  %p5407_p5 = pmov %p5406_p0 }
 0x172   : > { %p5408_p7 = pmov %p5406_p0 }
 0x173   : > { %4437 = dma.done.wait (%p5407_p5), [#allocation13], 1040  }
 0x174   : > { %4439 = vsyncadd (%p5408_p7), [#allocation13], 4294966256  ;;  %p5409_p6 = pmov %p5406_p0 }
 0x175   : > { %p5410_p9 = pmov %p5406_p0 }
 0x176   : > { %4441 = dma.done.wait (%p5409_p6), [#allocation16], 32  }
 0x177   : > { %4443 = vsyncadd (%p5410_p9), [#allocation16], 4294967264  ;;  %p5411_p4 = pmov %p5406_p0 }
 0x178   : > { %p5412_p13 = pmov %p5406_p0 }
 0x179   : > { %4445 = dma.done.wait (%p5411_p4), [#allocation19], 4160  }
 0x17a   : > { %4447 = vsyncadd (%p5412_p13), [#allocation19], 4294963136  ;;  %p5413_p1 = pmov %p5406_p0 }
 0x17b   : > { %p5414_p3 = pmov %p5406_p0 }
 0x17c   : > { %4449 = dma.done.wait (%p5413_p1), [#allocation22], 4112  }
 0x17d   : > { %4451 = vsyncadd (%p5414_p3), [#allocation22], 4294963184  ;;  %v621_v0 = vld [vmem:[%s4948_s25] sm:$0xff]  ;;  %v623_v1 = vld [vmem:[%s4948_s25 + $0x10] sm:$0xff]  ;;  %v4493_v39 = vmov 0   ;;  %vm4495_vm0 = vmmov 0  }
 0x17e   : > { %v622_v2 = vld [vmem:[%s4948_s25 + $0x8] sm:$0xff]  ;;  %633 = vadd.xlane.f32.xlu0 %v621_v0  ;;  %637 = vadd.xlane.f32.xlu1 %v623_v1  ;;  %v624_v3 = vld [vmem:[%s4948_s25 + $0x18] sm:$0xff]  ;;  %v3780_v5 = vld [vmem:[#allocation9] ss:$12 sps:$4 sm:$0xff]   ;;  %vm988_vm1 = vcmask 261120   ;;  %vm1083_vm2 = vcmask 130048  }
 0x17f   : > { %v3778_v4 = vld [vmem:[#allocation9 + $0x4] ss:$12 sps:$4 sm:$0xff]   ;;  %v3781_v6 = vld [vmem:[#allocation9 + $0x1c] ss:$12 sps:$4 sm:$0xff]   ;;  %v3785_v25 = vld [vmem:[#allocation9 + $0x34] ss:$12 sps:$4 sm:$0xff]   ;;  %908 = vmatprep.mubr.bf16.mxu0 %v4493_v39 }
 0x180   : > { %v3783_v7 = vld [vmem:[#allocation9 + $0x8] ss:$12 sps:$4 sm:$0xff]   ;;  %876 = vmatprep.subr.bf16.mxu0 %v3778_v4  ;;  %v3784_v24 = vld [vmem:[#allocation9 + $0x18] ss:$12 sps:$4 sm:$0xff]   ;;  %v3787_v26 = vld [vmem:[#allocation9 + $0x20] ss:$12 sps:$4 sm:$0xff]  }
 0x181   : > { %877 = vmatpush1.bf16.msra.mxu0 %v3780_v5  ;;  %3459 = vmatprep.subr.bf16.mxu1 %v3783_v7  ;;  %v3788_v27 = vld [vmem:[#allocation9 + $0x30] ss:$12 sps:$4 sm:$0xff]   ;;  %v3789_v28 = vld [vmem:[#allocation9 + $0x4c] ss:$12 sps:$4 sm:$0xff]   ;;  %v3792_v30 = vld [vmem:[#allocation9 + $0x48] ss:$12 sps:$4 sm:$0xff]  }
 0x182   : > { %635 = vadd.xlane.f32.xlu0 %v622_v2  ;;  %639 = vadd.xlane.f32.xlu1 %v624_v3  ;;  %v3791_v29 = vld [vmem:[#allocation9 + $0x38] ss:$12 sps:$4 sm:$0xff]   ;;  %v3795_v32 = vld [vmem:[#allocation9 + $0x50] ss:$12 sps:$4 sm:$0xff]   ;;  %v3796_v33 = vld [vmem:[#allocation9 + $0x60] ss:$12 sps:$4 sm:$0xff]  }
 0x183   : > { %878 = vmatprep.subr.bf16.mxu0 %v3781_v6  ;;  %3460 = vmatpush3.bf16.msra.mxu1 %v3783_v7  ;;  %v3793_v31 = vld [vmem:[#allocation9 + $0x64] ss:$12 sps:$4 sm:$0xff]   ;;  %v3797_v34 = vld [vmem:[#allocation9 + $0x7c] ss:$12 sps:$4 sm:$0xff]   ;;  %v3801_v37 = vld [vmem:[#allocation9 + $0x94] ss:$12 sps:$4 sm:$0xff]  }
 0x184   : > { %3461 = vmatprep.subr.bf16.mxu1 %v3787_v26  ;;  %v3799_v35 = vld [vmem:[#allocation9 + $0x68] ss:$12 sps:$4 sm:$0xff]   ;;  %v3800_v36 = vld [vmem:[#allocation9 + $0x78] ss:$12 sps:$4 sm:$0xff]   ;;  %v3803_v38 = vld [vmem:[#allocation9 + $0x80] ss:$12 sps:$4 sm:$0xff]  }
 0x185   : > { %879 = vmatpush1.bf16.msra.mxu0 %v3784_v24  ;;  %v3804_v40 = vld [vmem:[#allocation9 + $0x90] ss:$12 sps:$4 sm:$0xff]   ;;  %v3805_v41 = vld [vmem:[#allocation9 + $0xac] ss:$12 sps:$4 sm:$0xff]   ;;  %v3808_v43 = vld [vmem:[#allocation9 + $0xa8] ss:$12 sps:$4 sm:$0xff]  }
 0x186   : > { %880 = vmatprep.subr.bf16.mxu0 %v3785_v25  ;;  %v3807_v42 = vld [vmem:[#allocation9 + $0x98] ss:$12 sps:$4 sm:$0xff]   ;;  %v3809_v44 = vld [vmem:[#allocation9 + $0xb0] ss:$12 sps:$4 sm:$0xff]   ;;  %s4496_s1 = smov 96   ;;  %s4497_s3 = smov 64  }
 0x187   : > { %3462 = vmatpush3.bf16.msra.mxu1 %v3787_v26  ;;  %v3223_v59 = vld [vmem:[#allocation6] ss:$0 sm:$0xff]  ;;  %s4498_s30 = smov 32   ;;  %vm1486_vm3 = vcmask 523520   ;;  %vm1749_vm4 = vcmask 785920   ;;  %vm2012_vm5 = vcmask 1048320  }
 0x188   : > { %3463 = vmatprep.subr.bf16.mxu1 %v3791_v29  ;;  %s617_s13 = scalar_lea.vmem [#allocation24], %s3209_s21  ;;  %s3350_s14 = sshll.u32 %s5402_s15, 9 }
 0x189   : > { %881 = vmatpush1.bf16.msra.mxu0 %v3788_v27  ;;  %s3002_s19 = sshll.u32 %s617_s13, 4  ;;  %s5415_s21 = sld [smem:[#allocation39_spill]]  ;;  %s5301_s19 = int_to_ptr.vmem [resolvable:$true] %s3002_s19 }
 0x18a   : > { %882 = vmatprep.subr.bf16.mxu0 %v3789_v28  ;;  %p5416_p8 = scmp.ne.s32.totalorder %s5396_s22, 0  ;;  %s4499_s15 = smov [#allocation24]  }
 0x18b   : > { %3464 = vmatpush3.bf16.msra.mxu1 %v3791_v29 }
 0x18c   : > { %3465 = vmatprep.subr.bf16.mxu1 %v3795_v32 }
 0x18d   : > { %883 = vmatpush1.bf16.msra.mxu0 %v3792_v30 }
 0x18e   : > { %884 = vmatprep.subr.bf16.mxu0 %v3793_v31 }
 0x18f   : > { %3466 = vmatpush3.bf16.msra.mxu1 %v3795_v32  ;;  %s5307_s16 = scalar_lea.hbm %s5415_s21, %s3350_s14 }
 0x190   : > { %3467 = vmatprep.subr.bf16.mxu1 %v3799_v35 }
 0x191   : > { %885 = vmatpush1.bf16.msra.mxu0 %v3796_v33 }
 0x192   : > { %886 = vmatprep.subr.bf16.mxu0 %v3797_v34 }
 0x193   : > { %3468 = vmatpush3.bf16.msra.mxu1 %v3799_v35 }
 0x194   : > { %3469 = vmatprep.subr.bf16.mxu1 %v3803_v38 }
 0x195   : > { %887 = vmatpush1.bf16.msra.mxu0 %v3800_v36 }
 0x196   : > { %888 = vmatprep.subr.bf16.mxu0 %v3801_v37 }
 0x197   : > { %3470 = vmatpush3.bf16.msra.mxu1 %v3803_v38 }
 0x198   : > { %3471 = vmatprep.subr.bf16.mxu1 %v3807_v42 }
 0x199   : > { %889 = vmatpush1.bf16.msra.mxu0 %v3804_v40 }
 0x19a   : > { %890 = vmatprep.subr.bf16.mxu0 %v3805_v41 }
 0x19b   : > { %3472 = vmatpush3.bf16.msra.mxu1 %v3807_v42 }
 0x19c   : > { %3473 = vmatprep.subr.bf16.mxu1 %v3809_v44 }
 0x19d   : > { %891 = vmatpush1.bf16.msra.mxu0 %v3808_v43 }
 0x19f   : > { %3474 = vmatpush3.bf16.msra.mxu1 %v3809_v44 }
 0x20b   : > { %v634_v8 = vpop.xlane.xlu0 %633  ;;  %v638_v9 = vpop.xlane.xlu1 %637 }
 0x20c   : > { %v642_v10 = vmul.f32 0.0078125, %v634_v8  ;;  %v644_v11 = vmul.f32 0.0078125, %v638_v9 }
 0x20e   : > { %v4982_v12 = vsub.f32 %v621_v0, %v642_v10  ;;  %v4984_v13 = vsub.f32 %v623_v1, %v644_v11  ;;  %v3224_v0 = vld [vmem:[#allocation8] ss:$0 sm:$0xff] }
 0x20f   : > { %v636_v14 = vpop.xlane.xlu0 %635  ;;  %v640_v15 = vpop.xlane.xlu1 %639 }
 0x210   : > { %v643_v16 = vmul.f32 0.0078125, %v636_v14  ;;  %v650_v17 = vmul.f32 %v4982_v12, %v4982_v12  ;;  %v645_v18 = vmul.f32 0.0078125, %v640_v15  ;;  %v652_v21 = vmul.f32 %v4984_v13, %v4984_v13 }
 0x211   : > { %v4494_v14 = vmov 0.0  }
 0x212   : > { %v4988_v19 = vsub.f32 %v622_v2, %v643_v16  ;;  %654 = vadd.xlane.f32.xlu0 %v650_v17  ;;  %v4990_v20 = vsub.f32 %v624_v3, %v645_v18  ;;  %3479 = vmatprep.subr.bf16.mxu0 %v4494_v14  ;;  %v627_v17 = vld [vmem:[#allocation11] sm:$0x7] }
 0x213   : > { %3491 = vmatprep.subr.bf16.mxu1 %v4494_v14 }
 0x214   : > { %v651_v22 = vmul.f32 %v4988_v19, %v4988_v19  ;;  %v653_v23 = vmul.f32 %v4990_v20, %v4990_v20 }
 0x216   : > { %658 = vadd.xlane.f32.xlu0 %v652_v21  ;;  %656 = vadd.xlane.f32.xlu1 %v651_v22 }
 0x21a   : > { %660 = vadd.xlane.f32.xlu1 %v653_v23 }
 0x29f   : > { %v655_v45 = vpop.xlane.xlu0 %654 }
 0x2a0   : > { %v662_v46 = vmul.f32 0.0078125, %v655_v45 }
 0x2a2   : > { %v666_v47 = vadd.f32 1e-06, %v662_v46 }
 0x2a3   : > { %v657_v48 = vpop.xlane.xlu1 %656  ;;  %v659_v49 = vpop.xlane.xlu0 %658 }
 0x2a4   : > { %3898 = vrsqrt.f32 %v666_v47  ;;  %v663_v50 = vmul.f32 0.0078125, %v657_v48  ;;  %v664_v51 = vmul.f32 0.0078125, %v659_v49 }
 0x2a6   : > { %v667_v52 = vadd.f32 1e-06, %v663_v50  ;;  %v668_v53 = vadd.f32 1e-06, %v664_v51 }
 0x2a7   : > { %v661_v54 = vpop.xlane.xlu1 %660 }
 0x2a8   : > { %3900 = vrsqrt.f32 %v667_v52  ;;  %v665_v55 = vmul.f32 0.0078125, %v661_v54 }
 0x2a9   : > { %3902 = vrsqrt.f32 %v668_v53 }
 0x2aa   : > { %v669_v56 = vadd.f32 1e-06, %v665_v55 }
 0x2ac   : > { %3904 = vrsqrt.f32 %v669_v56 }
 0x2ae   : > { %v3899_v57 = vpop.eup %3898 }
 0x2af   : > { %v674_v58 = vmul.f32 %v3899_v57, %v4982_v12 }
 0x2b1   : > { %v684_v63 = vmul.f32 %v3223_v59, %v674_v58 }
 0x2b2   : > { %v3901_v60 = vpop.eup %3900 }
 0x2b3   : > { %v3903_v61 = vpop.eup %3902  ;;  %v675_v62 = vmul.f32 %v3901_v60, %v4988_v19  ;;  %v694_v4 = vadd.f32 %v3224_v0, %v684_v63 }
 0x2b4   : > { %v676_v1 = vmul.f32 %v3903_v61, %v4984_v13  ;;  %v733_v13 = vlaneseq }
 0x2b5   : > { %v685_v2 = vmul.f32 %v3223_v59, %v675_v62 }
 0x2b6   : > { %v3905_v3 = vpop.eup %3904  ;;  %v686_v7 = vmul.f32 %v3223_v59, %v676_v1  ;;  %v5010_v15 = vshrl.u32 %v733_v13, 7 }
 0x2b7   : > { %v695_v5 = vadd.f32 %v3224_v0, %v685_v2  ;;  %v677_v6 = vmul.f32 %v3905_v3, %v4990_v20 }
 0x2b8   : > { %v696_v10 = vadd.f32 %v3224_v0, %v686_v7  ;;  %v735_v16 = vsub.s32 0, %v5010_v15  ;;  %v739_v18 = vsub.s32 1, %v5010_v15  ;;  %v743_v20 = vsub.s32 2, %v5010_v15 }
 0x2b9   : > { %v698_v8 = vpack.c.bf16 %v695_v5, %v694_v4  ;;  %v687_v9 = vmul.f32 %v3223_v59, %v677_v6 }
 0x2ba   : > { %v736_v19 = vrot.slane %v627_v17, %v735_v16  ;;  %v740_v22 = vrot.slane %v627_v17, %v739_v18  ;;  %v744_v28 = vrot.slane %v627_v17, %v743_v20 }
 0x2bb   : > { %909 = vmatmul.mubr.bf16.vlgmr.msra.gmra.mrb[0].mxu0 %v698_v8  ;;  %3475 = vmatprep.mubr.bf16.mxu1 %v698_v8  ;;  %v697_v11 = vadd.f32 %v3224_v0, %v687_v9 }
 0x2bc   : > { %918 = vmatprep.mubr.bf16.mxu0 %v4493_v39 }
 0x2bd   : > { %v699_v12 = vpack.c.bf16 %v697_v11, %v696_v10 }
 0x2bf   : > { %3476 = vmatmul.mubr.bf16.vlgmr.msra.gmra.mrb[0].mxu1 %v699_v12 }
 0x2c0   : > { %3493 = vmatprep.mubr.msk.bf16.mxu1 %vm4495_vm0, %v4494_v14 }
 0x2c3   : > { %919 = vmatmul.mubr.bf16.gmra.mrb[4].mxu0 %v699_v12 }
 0x2c4   : > { %3481 = vmatprep.mubr.msk.bf16.mxu0 %vm4495_vm0, %v4494_v14 }
 0x38e   : > { %v910_v21 = vpop.f32.mrb[0].mxu0 }
 0x38f   : > { %v911_v23 = vadd.f32 %v910_v21, %v736_v19  ;;  %v912_v24 = vpop.f32.mrb[1].mxu0 }
 0x390   : > { %v914_v25 = vpop.f32.mrb[2].mxu0  ;;  %v913_v29 = vadd.f32 %v912_v24, %v740_v22 }
 0x391   : > { %v915_v26 = vadd.f32 %v914_v25, %v736_v19  ;;  %v916_v27 = vpop.f32.mrb[3].mxu0  ;;  %v978_v32 = vmul.f32 0.17677669, %v911_v23 }
 0x392   : > { %v917_v30 = vadd.f32 %v916_v27, %v740_v22  ;;  %v3477_v31 = vpop.f32.mrb[0].mxu1 }
 0x393   : > { %v979_v33 = vmul.f32 0.17677669, %v915_v26  ;;  %v963_v34 = vpop.f32.mrb[1].mxu1  ;;  %v972_v38 = vadd.f32 %v3477_v31, %v744_v28 }
 0x394   : > { %v5021_v35 = vpack.c.bf16 %v917_v30, %v913_v29  ;;  %v3478_v36 = vpop.f32.mrb[2].mxu1  ;;  %v964_v42 = vadd.f32 %v963_v34, %v744_v28 }
 0x395   : > { %v5023_v37 = vpack.c.bf16 %v979_v33, %v978_v32  ;;  %v975_v40 = vadd.f32 %v3478_v36, %v744_v28  ;;  %v966_v41 = vpop.f32.mrb[3].mxu1 }
 0x396   : > { %v967_v43 = vadd.f32 %v966_v41, %v744_v28  ;;  %v920_v44 = vpop.f32.mrb[4].mxu0  ;;  %v993_v45 = vsel %vm988_vm1, %v5021_v35, 0 }
 0x397   : > { %v5027_v46 = vpack.c.bf16 %v975_v40, %v972_v38  ;;  %v921_v47 = vadd.f32 %v920_v44, %v736_v19  ;;  %v922_v48 = vpop.f32.mrb[5].mxu0  ;;  %3480 = vmatpush3.bf16.xpose.msra.mxu0 %v993_v45 }
 0x398   : > { %v5029_v49 = vpack.c.bf16 %v967_v43, %v964_v42  ;;  %v924_v50 = vpop.f32.mrb[6].mxu0  ;;  %3485 = vmatprep.subr.bf16.mxu0 %v4494_v14  ;;  %v923_v53 = vadd.f32 %v922_v48, %v740_v22 }
 0x399   : > { %v925_v51 = vadd.f32 %v924_v50, %v736_v19  ;;  %v926_v52 = vpop.f32.mrb[7].mxu0  ;;  %v980_v55 = vmul.f32 0.17677669, %v921_v47 }
 0x39a   : > { %v927_v54 = vadd.f32 %v926_v52, %v740_v22  ;;  %3492 = vmatpush3.bf16.msra.mxu1 %v5029_v49 }
 0x39b   : > { %v981_v56 = vmul.f32 0.17677669, %v925_v51  ;;  %3503 = vmatprep.subr.bf16.mxu1 %v4494_v14 }
 0x39c   : > { %v5034_v57 = vpack.c.bf16 %v927_v54, %v923_v53 }
 0x39d   : > { %v5036_v58 = vpack.c.bf16 %v981_v56, %v980_v55 }
 0x39e   : > { %3482 = vmatmul.mubr.msk.bf16.vlgmr.msra.gmra.mrb[8].mxu0 %vm988_vm1, %v5023_v37  ;;  %v1040_v59 = vsel %vm988_vm1, %v5034_v57, 0 }
 0x39f   : > { %3486 = vmatpush3.bf16.xpose.msra.mxu0 %v1040_v59  ;;  %3487 = vmatprep.mubr.msk.bf16.mxu0 %vm4495_vm0, %v4494_v14 }
 0x3a0   : > { %3497 = vmatprep.subr.bf16.mxu0 %v4494_v14 }
 0x3a6   : > { %3488 = vmatmul.mubr.msk.bf16.vlgmr.msra.gmra.mrb[12].mxu0 %vm988_vm1, %v5036_v58 }
 0x3a7   : > { %3498 = vmatpush3.bf16.msra.mxu0 %v5027_v46  ;;  %3499 = vmatprep.mubr.msk.bf16.mxu0 %vm4495_vm0, %v4494_v14 }
 0x3a8   : > { %3509 = vmatprep.subr.bf16.mxu0 %v4494_v14 }
 0x471   : > { %v1029_v60 = vpop.f32.mrb[8].mxu0 }
 0x472   : > { %v3483_v61 = vpop.f32.mrb[9].mxu0  ;;  %v1084_v62 = vsel %vm1083_vm2, %v1029_v60, -inf }
 0x473   : > { %1085 = vmax.xlane.f32.xlu0 %v1084_v62  ;;  %v1032_v63 = vpop.f32.mrb[10].mxu0 }
 0x474   : > { %v3484_v0 = vpop.f32.mrb[11].mxu0  ;;  %v1087_v1 = vsel %vm1083_vm2, %v1032_v63, -inf }
 0x475   : > { %1088 = vmax.xlane.f32.xlu1 %v1087_v1 }
 0x479   : > { %v1076_v2 = vpop.f32.mrb[12].mxu0 }
 0x47a   : > { %v3489_v3 = vpop.f32.mrb[13].mxu0  ;;  %v1090_v4 = vsel %vm1083_vm2, %v1076_v2, -inf }
 0x47b   : > { %1091 = vmax.xlane.f32.xlu0 %v1090_v4  ;;  %v1079_v5 = vpop.f32.mrb[14].mxu0 }
 0x47c   : > { %v3490_v6 = vpop.f32.mrb[15].mxu0  ;;  %v1093_v7 = vsel %vm1083_vm2, %v1079_v5, -inf }
 0x47d   : > { %1094 = vmax.xlane.f32.xlu1 %v1093_v7 }
 0x500   : > { %v1086_v8 = vpop.xlane.xlu0 %1085 }
 0x501   : > { %v1096_v9 = vsub.f32 %v1029_v60, %v1086_v8 }
 0x502   : > { %v1089_v10 = vpop.xlane.xlu1 %1088 }
 0x503   : > { %v1100_v11 = vmul.f32 1.442695, %v1096_v9  ;;  %v1097_v12 = vsub.f32 %v1032_v63, %v1089_v10 }
 0x505   : > { %3906 = vpow2.f32 %v1100_v11  ;;  %v1102_v13 = vmul.f32 1.442695, %v1097_v12 }
 0x507   : > { %3908 = vpow2.f32 %v1102_v13 }
 0x508   : > { %v1092_v17 = vpop.xlane.xlu0 %1091 }
 0x509   : > { %v1098_v19 = vsub.f32 %v1076_v2, %v1092_v17 }
 0x50a   : > { %v1095_v28 = vpop.xlane.xlu1 %1094 }
 0x50b   : > { %v1104_v21 = vmul.f32 1.442695, %v1098_v19  ;;  %v1099_v29 = vsub.f32 %v1079_v5, %v1095_v28 }
 0x50d   : > { %3910 = vpow2.f32 %v1104_v21  ;;  %v1106_v30 = vmul.f32 1.442695, %v1099_v29 }
 0x50f   : > { %v3907_v22 = vpop.eup %3906  ;;  %3912 = vpow2.f32 %v1106_v30 }
 0x510   : > { %v1108_v23 = vsel %vm1083_vm2, %v3907_v22, 0.0 }
 0x511   : > { %v3909_v24 = vpop.eup %3908  ;;  %1109 = vadd.xlane.f32.xlu0 %v1108_v23 }
 0x512   : > { %v1111_v25 = vsel %vm1083_vm2, %v3909_v24, 0.0 }
 0x513   : > { %1112 = vadd.xlane.f32.xlu1 %v1111_v25 }
 0x517   : > { %v3911_v26 = vpop.eup %3910 }
 0x518   : > { %v1114_v27 = vsel %vm1083_vm2, %v3911_v26, 0.0 }
 0x519   : > { %1115 = vadd.xlane.f32.xlu0 %v1114_v27  ;;  %v3913_v31 = vpop.eup %3912 }
 0x51a   : > { %v1117_v32 = vsel %vm1083_vm2, %v3913_v31, 0.0 }
 0x524   : > { %1279 = vrot.lane.b32.xlu1 %v5034_v57, %s4496_s1 }
 0x52f   : > { %1226 = vrot.lane.b32.xlu0 %v5021_v35, %s4496_s1 }
 0x548   : > { %1118 = vadd.xlane.f32.xlu1 %v1117_v32 }
 0x559   : > { %1223 = vrot.lane.b32.xlu1 %v5023_v37, %s4496_s1 }
 0x55d   : > { %1276 = vrot.lane.b32.xlu1 %v5036_v58, %s4496_s1 }
 0x59e   : > { %v1110_v33 = vpop.xlane.xlu0 %1109 }
 0x59f   : > { %3914 = vrcp.f32 %v1110_v33 }
 0x5a0   : > { %v1113_v34 = vpop.xlane.xlu1 %1112 }
 0x5a1   : > { %3916 = vrcp.f32 %v1113_v34 }
 0x5a4   : > { %v1280_v47 = vpop.permute.xlu1 %1279 }
 0x5a5   : > { %v1285_v56 = vsel %vm988_vm1, %v1280_v47, 0 }
 0x5a6   : > { %v1116_v36 = vpop.xlane.xlu0 %1115 }
 0x5a7   : > { %3918 = vrcp.f32 %v1116_v36 }
 0x5a9   : > { %v3915_v38 = vpop.eup %3914 }
 0x5aa   : > { %v1124_v41 = vmul.f32 %v3915_v38, %v3907_v22  ;;  %v1227_v43 = vpop.permute.xlu0 %1226 }
 0x5ab   : > { %v3917_v40 = vpop.eup %3916  ;;  %v1232_v45 = vsel %vm988_vm1, %v1227_v43, 0 }
 0x5ac   : > { %v1125_v42 = vmul.f32 %v3917_v40, %v3909_v24 }
 0x5ae   : > { %v1128_v44 = vpack.c.bf16 %v1125_v42, %v1124_v41 }
 0x5b0   : > { %3494 = vmatmul.mubr.msk.bf16.vlgmr.msra.gmra.mrb[4].mxu1 %vm1083_vm2, %v1128_v44 }
 0x5b1   : > { %3504 = vmatpush3.bf16.xpose.msra.mxu1 %v1232_v45  ;;  %3505 = vmatprep.mubr.msk.bf16.mxu1 %vm4495_vm0, %v4494_v14  ;;  %v3919_v51 = vpop.eup %3918 }
 0x5b2   : > { %3515 = vmatprep.subr.bf16.mxu1 %v4494_v14  ;;  %v1126_v53 = vmul.f32 %v3919_v51, %v3911_v26 }
 0x5d5   : > { %v1119_v48 = vpop.xlane.xlu1 %1118 }
 0x5d6   : > { %3920 = vrcp.f32 %v1119_v48 }
 0x5d9   : > { %v1224_v50 = vpop.permute.xlu1 %1223 }
 0x5da   : > { %3506 = vmatmul.mubr.msk.bf16.vlgmr.msra.gmra.mrb[8].mxu1 %vm988_vm1, %v1224_v50 }
 0x5db   : > { %3517 = vmatprep.mubr.msk.bf16.mxu1 %vm4495_vm0, %v4494_v14 }
 0x5dd   : > { %v1277_v59 = vpop.permute.xlu1 %1276 }
 0x5e0   : > { %v3921_v52 = vpop.eup %3920 }
 0x5e1   : > { %v1127_v54 = vmul.f32 %v3921_v52, %v3913_v31 }
 0x5e3   : > { %v1129_v55 = vpack.c.bf16 %v1127_v54, %v1126_v53 }
 0x5e5   : > { %3500 = vmatmul.mubr.msk.bf16.vlgmr.msra.gmra.mrb[16].mxu0 %vm1083_vm2, %v1129_v55 }
 0x5e6   : > { %3510 = vmatpush3.bf16.xpose.msra.mxu0 %v1285_v56  ;;  %3511 = vmatprep.mubr.msk.bf16.mxu0 %vm4495_vm0, %v4494_v14 }
 0x5e7   : > { %3521 = vmatprep.subr.bf16.mxu0 %v4494_v14 }
 0x5ed   : > { %3512 = vmatmul.mubr.msk.bf16.vlgmr.msra.gmra.mrb[20].mxu0 %vm988_vm1, %v1277_v59 }
 0x5ee   : > { %3523 = vmatprep.mubr.msk.bf16.mxu0 %vm4495_vm0, %v4494_v14 }
 0x683   : > { %v1167_v60 = vpop.f32.mrb[4].mxu1 }
 0x684   : > { %1218 = vst.msk [vmem:[#allocation2] sm:$0xff] %vm988_vm1, %v1167_v60  ;;  %v3495_v61 = vpop.f32.mrb[5].mxu1 }
 0x685   : > { %v1170_v62 = vpop.f32.mrb[6].mxu1 }
 0x686   : > { %1219 = vst.msk [vmem:[#allocation2 + $0x8] sm:$0xff] %vm988_vm1, %v1170_v62  ;;  %v3496_v63 = vpop.f32.mrb[7].mxu1 }
 0x6ad   : > { %v1268_v0 = vpop.f32.mrb[8].mxu1 }
 0x6ae   : > { %v3507_v1 = vpop.f32.mrb[9].mxu1  ;;  %v1328_v2 = vsel %vm1083_vm2, %v1268_v0, -inf }
 0x6af   : > { %1329 = vmax.xlane.f32.xlu0 %v1328_v2  ;;  %v1271_v3 = vpop.f32.mrb[10].mxu1 }
 0x6b0   : > { %v3508_v4 = vpop.f32.mrb[11].mxu1  ;;  %v1331_v5 = vsel %vm1083_vm2, %v1271_v3, -inf }
 0x6b1   : > { %1332 = vmax.xlane.f32.xlu1 %v1331_v5 }
 0x6b8   : > { %v1211_v6 = vpop.f32.mrb[16].mxu0 }
 0x6b9   : > { %1220 = vst.msk [vmem:[#allocation2 + $0x10] sm:$0xff] %vm988_vm1, %v1211_v6  ;;  %v3501_v7 = vpop.f32.mrb[17].mxu0 }
 0x6ba   : > { %v1214_v8 = vpop.f32.mrb[18].mxu0 }
 0x6bb   : > { %1221 = vst.msk [vmem:[#allocation2 + $0x18] sm:$0xff] %vm988_vm1, %v1214_v8  ;;  %v3502_v9 = vpop.f32.mrb[19].mxu0 }
 0x6c0   : > { %v1321_v10 = vpop.f32.mrb[20].mxu0 }
 0x6c1   : > { %v3513_v11 = vpop.f32.mrb[21].mxu0  ;;  %v1334_v12 = vsel %vm1083_vm2, %v1321_v10, -inf }
 0x6c2   : > { %1335 = vmax.xlane.f32.xlu0 %v1334_v12  ;;  %v1324_v13 = vpop.f32.mrb[22].mxu0 }
 0x6c3   : > { %v3514_v17 = vpop.f32.mrb[23].mxu0  ;;  %v1337_v19 = vsel %vm1083_vm2, %v1324_v13, -inf }
 0x6c6   : > { %1338 = vmax.xlane.f32.xlu0 %v1337_v19 }
 0x73c   : > { %v1330_v21 = vpop.xlane.xlu0 %1329 }
 0x73d   : > { %v1340_v22 = vsub.f32 %v1268_v0, %v1330_v21 }
 0x73e   : > { %v1333_v23 = vpop.xlane.xlu1 %1332 }
 0x73f   : > { %v1344_v24 = vmul.f32 1.442695, %v1340_v22  ;;  %v1341_v25 = vsub.f32 %v1271_v3, %v1333_v23 }
 0x741   : > { %3922 = vpow2.f32 %v1344_v24  ;;  %v1346_v26 = vmul.f32 1.442695, %v1341_v25 }
 0x743   : > { %3924 = vpow2.f32 %v1346_v26 }
 0x74b   : > { %v3923_v27 = vpop.eup %3922 }
 0x74c   : > { %v1352_v28 = vsel %vm1083_vm2, %v3923_v27, 0.0 }
 0x74d   : > { %v3925_v29 = vpop.eup %3924  ;;  %1353 = vadd.xlane.f32.xlu0 %v1352_v28 }
 0x74e   : > { %v1355_v30 = vsel %vm1083_vm2, %v3925_v29, 0.0 }
 0x74f   : > { %1356 = vadd.xlane.f32.xlu1 %v1355_v30  ;;  %v1336_v31 = vpop.xlane.xlu0 %1335 }
 0x750   : > { %v1342_v32 = vsub.f32 %v1321_v10, %v1336_v31 }
 0x752   : > { %v1348_v33 = vmul.f32 1.442695, %v1342_v32 }
 0x753   : > { %v1339_v38 = vpop.xlane.xlu0 %1338 }
 0x754   : > { %3926 = vpow2.f32 %v1348_v33  ;;  %v1343_v40 = vsub.f32 %v1324_v13, %v1339_v38 }
 0x756   : > { %v1350_v41 = vmul.f32 1.442695, %v1343_v40 }
 0x758   : > { %3928 = vpow2.f32 %v1350_v41 }
 0x75e   : > { %v3927_v34 = vpop.eup %3926 }
 0x75f   : > { %v1358_v36 = vsel %vm1083_vm2, %v3927_v34, 0.0 }
 0x760   : > { %1423 = vrot.lane.b32.xlu1 %v5027_v46, %s4496_s1  ;;  %1359 = vadd.xlane.f32.xlu0 %v1358_v36 }
 0x762   : > { %v3929_v42 = vpop.eup %3928 }
 0x763   : > { %v1361_v43 = vsel %vm1083_vm2, %v3929_v42, 0.0 }
 0x764   : > { %1493 = vrot.lane.b32.xlu1 %v5021_v35, %s4497_s3 }
 0x776   : > { %1375 = vrot.lane.b32.xlu0 %v5029_v49, %s4496_s1 }
 0x77a   : > { %1491 = vrot.lane.b32.xlu0 %v5023_v37, %s4497_s3 }
 0x788   : > { %1362 = vadd.xlane.f32.xlu1 %v1361_v43 }
 0x799   : > { %1544 = vrot.lane.b32.xlu1 %v5034_v57, %s4497_s3 }
 0x79d   : > { %1542 = vrot.lane.b32.xlu1 %v5036_v58, %s4497_s3 }
 0x7da   : > { %v1354_v47 = vpop.xlane.xlu0 %1353 }
 0x7dc   : > { %v1357_v44 = vpop.xlane.xlu1 %1356 }
 0x7dd   : > { %3930 = vrcp.f32 %v1357_v44 }
 0x7de   : > { %3932 = vrcp.f32 %v1354_v47 }
 0x7e0   : > { %v1424_v45 = vpop.permute.xlu1 %1423 }
 0x7e1   : > { %3522 = vmatpush3.bf16.msra.mxu0 %v1424_v45 }
 0x7e2   : > { %3533 = vmatprep.subr.bf16.mxu0 %v4494_v14 }
 0x7e4   : > { %v1494_v56 = vpop.permute.xlu1 %1493 }
 0x7e5   : > { %v1499_v59 = vsel %vm988_vm1, %v1494_v56, 0 }
 0x7e7   : > { %v3931_v48 = vpop.eup %3930 }
 0x7e8   : > { %v3933_v51 = vpop.eup %3932  ;;  %v1369_v52 = vmul.f32 %v3931_v48, %v3925_v29 }
 0x7e9   : > { %v1368_v53 = vmul.f32 %v3933_v51, %v3923_v27 }
 0x7eb   : > { %v1372_v55 = vpack.c.bf16 %v1369_v52, %v1368_v53 }
 0x7ed   : > { %v1360_v50 = vpop.xlane.xlu0 %1359 }
 0x7ee   : > { %3934 = vrcp.f32 %v1360_v50 }
 0x7f1   : > { %v1376_v54 = vpop.permute.xlu0 %1375 }
 0x7f2   : > { %3516 = vmatpush3.bf16.msra.mxu1 %v1376_v54 }
 0x7f3   : > { %3527 = vmatprep.subr.bf16.mxu1 %v4494_v14 }
 0x7f5   : > { %3518 = vmatmul.mubr.msk.bf16.vlgmr.msra.gmra.mrb[12].mxu1 %vm1083_vm2, %v1372_v55  ;;  %v1492_v60 = vpop.permute.xlu0 %1491 }
 0x7f6   : > { %3529 = vmatprep.mubr.msk.bf16.mxu1 %vm4495_vm0, %v4494_v14 }
 0x7f8   : > { %v3935_v62 = vpop.eup %3934 }
 0x7f9   : > { %v1370_v0 = vmul.f32 %v3935_v62, %v3927_v34 }
 0x7fb   : > { %3528 = vmatpush3.bf16.xpose.msra.mxu1 %v1499_v59 }
 0x7fc   : > { %3539 = vmatprep.subr.bf16.mxu1 %v4494_v14 }
 0x802   : > { %3530 = vmatmul.mubr.msk.bf16.vlgmr.msra.gmra.mrb[16].mxu1 %vm988_vm1, %v1492_v60 }
 0x803   : > { %3541 = vmatprep.mubr.msk.bf16.mxu1 %vm4495_vm0, %v4494_v14 }
 0x815   : > { %v1363_v61 = vpop.xlane.xlu1 %1362 }
 0x816   : > { %3936 = vrcp.f32 %v1363_v61 }
 0x819   : > { %v1545_v2 = vpop.permute.xlu1 %1544 }
 0x81a   : > { %v1550_v4 = vsel %vm988_vm1, %v1545_v2, 0 }
 0x81d   : > { %v1543_v5 = vpop.permute.xlu1 %1542 }
 0x820   : > { %v3937_v63 = vpop.eup %3936 }
 0x821   : > { %v1371_v1 = vmul.f32 %v3937_v63, %v3929_v42 }
 0x823   : > { %v1373_v3 = vpack.c.bf16 %v1371_v1, %v1370_v0 }
 0x825   : > { %3524 = vmatmul.mubr.msk.bf16.vlgmr.msra.gmra.mrb[24].mxu0 %vm1083_vm2, %v1373_v3 }
 0x826   : > { %3534 = vmatpush3.bf16.xpose.msra.mxu0 %v1550_v4  ;;  %3535 = vmatprep.mubr.msk.bf16.mxu0 %vm4495_vm0, %v4494_v14 }
 0x827   : > { %3545 = vmatprep.subr.bf16.mxu0 %v4494_v14 }
 0x82d   : > { %3536 = vmatmul.mubr.msk.bf16.vlgmr.msra.gmra.mrb[28].mxu0 %vm988_vm1, %v1543_v5 }
 0x82e   : > { %3547 = vmatprep.mubr.msk.bf16.mxu0 %vm4495_vm0, %v4494_v14 }
 0x8c8   : > { %v5125_v6 = vpop.f32.mrb[12].mxu1 }
 0x8c9   : > { %v3519_v7 = vpop.f32.mrb[13].mxu1 }
 0x8ca   : > { %v5127_v8 = vpop.f32.mrb[14].mxu1 }
 0x8cb   : > { %v3520_v9 = vpop.f32.mrb[15].mxu1 }
 0x8d5   : > { %v1535_v10 = vpop.f32.mrb[16].mxu1 }
 0x8d6   : > { %v3531_v11 = vpop.f32.mrb[17].mxu1  ;;  %v1593_v12 = vsel %vm1083_vm2, %v1535_v10, -inf }
 0x8d7   : > { %1594 = vmax.xlane.f32.xlu0 %v1593_v12  ;;  %v1538_v13 = vpop.f32.mrb[18].mxu1 }
 0x8d8   : > { %v3532_v17 = vpop.f32.mrb[19].mxu1  ;;  %v1596_v19 = vsel %vm1083_vm2, %v1538_v13, -inf }
 0x8d9   : > { %1597 = vmax.xlane.f32.xlu1 %v1596_v19 }
 0x8f8   : > { %v5131_v21 = vpop.f32.mrb[24].mxu0 }
 0x8f9   : > { %v3525_v22 = vpop.f32.mrb[25].mxu0 }
 0x8fa   : > { %v5133_v23 = vpop.f32.mrb[26].mxu0 }
 0x8fb   : > { %v3526_v24 = vpop.f32.mrb[27].mxu0 }
 0x900   : > { %v1586_v25 = vpop.f32.mrb[28].mxu0 }
 0x901   : > { %v3537_v26 = vpop.f32.mrb[29].mxu0  ;;  %v1599_v27 = vsel %vm1083_vm2, %v1586_v25, -inf }
 0x902   : > { %1600 = vmax.xlane.f32.xlu0 %v1599_v27  ;;  %v1589_v28 = vpop.f32.mrb[30].mxu0 }
 0x903   : > { %v3538_v29 = vpop.f32.mrb[31].mxu0  ;;  %v1602_v30 = vsel %vm1083_vm2, %v1589_v28, -inf }
 0x906   : > { %1603 = vmax.xlane.f32.xlu0 %v1602_v30 }
 0x964   : > { %v1595_v31 = vpop.xlane.xlu0 %1594 }
 0x965   : > { %v1605_v32 = vsub.f32 %v1535_v10, %v1595_v31 }
 0x966   : > { %v1598_v33 = vpop.xlane.xlu1 %1597 }
 0x967   : > { %v1609_v34 = vmul.f32 1.442695, %v1605_v32  ;;  %v1606_v36 = vsub.f32 %v1538_v13, %v1598_v33 }
 0x969   : > { %3938 = vpow2.f32 %v1609_v34  ;;  %v1611_v38 = vmul.f32 1.442695, %v1606_v36 }
 0x96b   : > { %3940 = vpow2.f32 %v1611_v38 }
 0x973   : > { %v3939_v40 = vpop.eup %3938 }
 0x974   : > { %v1617_v41 = vsel %vm1083_vm2, %v3939_v40, 0.0 }
 0x975   : > { %v3941_v42 = vpop.eup %3940  ;;  %1618 = vadd.xlane.f32.xlu0 %v1617_v41 }
 0x976   : > { %v1620_v43 = vsel %vm1083_vm2, %v3941_v42, 0.0 }
 0x977   : > { %1621 = vadd.xlane.f32.xlu1 %v1620_v43 }
 0x988   : > { %1686 = vrot.lane.b32.xlu1 %v5027_v46, %s4497_s3 }
 0x98c   : > { %1756 = vrot.lane.b32.xlu1 %v5021_v35, %s4498_s30 }
 0x98f   : > { %v1601_v44 = vpop.xlane.xlu0 %1600 }
 0x990   : > { %v1607_v45 = vsub.f32 %v1586_v25, %v1601_v44 }
 0x992   : > { %v1613_v47 = vmul.f32 1.442695, %v1607_v45 }
 0x993   : > { %v1604_v48 = vpop.xlane.xlu0 %1603 }
 0x994   : > { %3942 = vpow2.f32 %v1613_v47  ;;  %v1608_v50 = vsub.f32 %v1589_v28, %v1604_v48 }
 0x996   : > { %v1615_v52 = vmul.f32 1.442695, %v1608_v50 }
 0x998   : > { %3944 = vpow2.f32 %v1615_v52 }
 0x99e   : > { %v3943_v51 = vpop.eup %3942 }
 0x99f   : > { %v1623_v53 = vsel %vm1083_vm2, %v3943_v51, 0.0 }
 0x9a0   : > { %1624 = vadd.xlane.f32.xlu0 %v1623_v53 }
 0x9a2   : > { %v3945_v54 = vpop.eup %3944 }
 0x9a3   : > { %v1626_v55 = vsel %vm1083_vm2, %v3945_v54, 0.0 }
 0x9b0   : > { %1627 = vadd.xlane.f32.xlu1 %v1626_v55 }
 0x9b6   : > { %1639 = vrot.lane.b32.xlu0 %v5029_v49, %s4497_s3 }
 0x9ba   : > { %1754 = vrot.lane.b32.xlu0 %v5023_v37, %s4498_s30 }
 0x9c1   : > { %1807 = vrot.lane.b32.xlu1 %v5034_v57, %s4498_s30 }
 0x9c5   : > { %1805 = vrot.lane.b32.xlu1 %v5036_v58, %s4498_s30 }
 0xa02   : > { %v1619_v59 = vpop.xlane.xlu0 %1618 }
 0xa04   : > { %v1622_v35 = vpop.xlane.xlu1 %1621 }
 0xa05   : > { %3946 = vrcp.f32 %v1622_v35 }
 0xa06   : > { %3948 = vrcp.f32 %v1619_v59 }
 0xa08   : > { %v1687_v56 = vpop.permute.xlu1 %1686 }
 0xa09   : > { %3546 = vmatpush3.bf16.msra.mxu0 %v1687_v56 }
 0xa0a   : > { %3557 = vmatprep.subr.bf16.mxu0 %v4494_v14 }
 0xa0c   : > { %v1757_v57 = vpop.permute.xlu1 %1756 }
 0xa0d   : > { %v1762_v58 = vsel %vm988_vm1, %v1757_v57, 0 }
 0xa0f   : > { %v3947_v60 = vpop.eup %3946 }
 0xa10   : > { %v3949_v62 = vpop.eup %3948  ;;  %v1634_v63 = vmul.f32 %v3947_v60, %v3941_v42 }
 0xa11   : > { %v1633_v0 = vmul.f32 %v3949_v62, %v3939_v40 }
 0xa13   : > { %v1637_v1 = vpack.c.bf16 %v1634_v63, %v1633_v0 }
 0xa2d   : > { %v1625_v61 = vpop.xlane.xlu0 %1624 }
 0xa2e   : > { %3950 = vrcp.f32 %v1625_v61 }
 0xa31   : > { %v1640_v37 = vpop.permute.xlu0 %1639 }
 0xa32   : > { %3540 = vmatpush3.bf16.msra.mxu1 %v1640_v37 }
 0xa33   : > { %3551 = vmatprep.subr.bf16.mxu1 %v4494_v14 }
 0xa35   : > { %3542 = vmatmul.mubr.msk.bf16.vlgmr.msra.gmra.mrb[20].mxu1 %vm1083_vm2, %v1637_v1  ;;  %v1755_v3 = vpop.permute.xlu0 %1754 }
 0xa36   : > { %3553 = vmatprep.mubr.msk.bf16.mxu1 %vm4495_vm0, %v4494_v14 }
 0xa38   : > { %v3951_v4 = vpop.eup %3950 }
 0xa39   : > { %v1635_v7 = vmul.f32 %v3951_v4, %v3943_v51 }
 0xa3b   : > { %3552 = vmatpush3.bf16.xpose.msra.mxu1 %v1762_v58 }
 0xa3c   : > { %3563 = vmatprep.subr.bf16.mxu1 %v4494_v14 }
 0xa3d   : > { %v1628_v2 = vpop.xlane.xlu1 %1627 }
 0xa3e   : > { %3952 = vrcp.f32 %v1628_v2 }
 0xa41   : > { %v1808_v10 = vpop.permute.xlu1 %1807 }
 0xa42   : > { %3554 = vmatmul.mubr.msk.bf16.vlgmr.msra.gmra.mrb[24].mxu1 %vm988_vm1, %v1755_v3  ;;  %v1813_v12 = vsel %vm988_vm1, %v1808_v10, 0 }
 0xa43   : > { %3565 = vmatprep.mubr.msk.bf16.mxu1 %vm4495_vm0, %v4494_v14 }
 0xa45   : > { %v1806_v13 = vpop.permute.xlu1 %1805 }
 0xa48   : > { %v3953_v5 = vpop.eup %3952 }
 0xa49   : > { %v1636_v9 = vmul.f32 %v3953_v5, %v3945_v54 }
 0xa4b   : > { %v1638_v11 = vpack.c.bf16 %v1636_v9, %v1635_v7 }
 0xa4d   : > { %3548 = vmatmul.mubr.msk.bf16.vlgmr.msra.gmra.mrb[32].mxu0 %vm1083_vm2, %v1638_v11 }
 0xa4e   : > { %3558 = vmatpush3.bf16.xpose.msra.mxu0 %v1813_v12  ;;  %3559 = vmatprep.mubr.msk.bf16.mxu0 %vm4495_vm0, %v4494_v14 }
 0xa4f   : > { %3569 = vmatprep.subr.bf16.mxu0 %v4494_v14 }
 0xa55   : > { %3560 = vmatmul.mubr.msk.bf16.vlgmr.msra.gmra.mrb[36].mxu0 %vm988_vm1, %v1806_v13 }
 0xa56   : > { %3571 = vmatprep.mubr.msk.bf16.mxu0 %vm4495_vm0, %v4494_v14 }
 0xb08   : > { %v1679_v17 = vpop.f32.mrb[20].mxu1 }
 0xb09   : > { %v3543_v19 = vpop.f32.mrb[21].mxu1 }
 0xb0a   : > { %v1682_v22 = vpop.f32.mrb[22].mxu1 }
 0xb0b   : > { %v3544_v24 = vpop.f32.mrb[23].mxu1 }
 0xb15   : > { %v1798_v25 = vpop.f32.mrb[24].mxu1 }
 0xb16   : > { %v3555_v26 = vpop.f32.mrb[25].mxu1  ;;  %v1856_v27 = vsel %vm1083_vm2, %v1798_v25, -inf }
 0xb17   : > { %1857 = vmax.xlane.f32.xlu0 %v1856_v27  ;;  %v1801_v28 = vpop.f32.mrb[26].mxu1  ;;  %v3810_v26 = vld [vmem:[#allocation12] sm:$0xff]   ;;  %v3811_v27 = vld [vmem:[#allocation12 + $0x8] sm:$0xff]  }
 0xb18   : > { %v3556_v29 = vpop.f32.mrb[27].mxu1  ;;  %v1859_v30 = vsel %vm1083_vm2, %v1801_v28, -inf }
 0xb19   : > { %1860 = vmax.xlane.f32.xlu1 %v1859_v30  ;;  %v3813_v29 = vld [vmem:[#allocation12 + $0x18] sm:$0xff]   ;;  %v3814_v30 = vld [vmem:[#allocation12 + $0x20] sm:$0xff]  }
 0xb20   : > { %v1726_v31 = vpop.f32.mrb[32].mxu0 }
 0xb21   : > { %v3549_v32 = vpop.f32.mrb[33].mxu0 }
 0xb22   : > { %v1729_v33 = vpop.f32.mrb[34].mxu0 }
 0xb23   : > { %v3550_v34 = vpop.f32.mrb[35].mxu0 }
 0xb28   : > { %v1849_v36 = vpop.f32.mrb[36].mxu0 }
 0xb29   : > { %v3561_v14 = vpop.f32.mrb[37].mxu0  ;;  %v1862_v38 = vsel %vm1083_vm2, %v1849_v36, -inf }
 0xb2a   : > { %1863 = vmax.xlane.f32.xlu0 %v1862_v38  ;;  %v1852_v40 = vpop.f32.mrb[38].mxu0  ;;  %v3817_v38 = vld [vmem:[#allocation12 + $0x38] sm:$0xff]  }
 0xb2b   : > { %v3562_v41 = vpop.f32.mrb[39].mxu0  ;;  %v1865_v42 = vsel %vm1083_vm2, %v1852_v40, -inf }
 0xb2e   : > { %1866 = vmax.xlane.f32.xlu0 %v1865_v42 }
 0xba4   : > { %v1858_v43 = vpop.xlane.xlu0 %1857 }
 0xba5   : > { %v1868_v44 = vsub.f32 %v1798_v25, %v1858_v43 }
 0xba6   : > { %v1861_v45 = vpop.xlane.xlu1 %1860 }
 0xba7   : > { %v1872_v47 = vmul.f32 1.442695, %v1868_v44  ;;  %v1869_v48 = vsub.f32 %v1801_v28, %v1861_v45  ;;  %v3812_v28 = vld [vmem:[#allocation12 + $0x10] sm:$0xff]  }
 0xba9   : > { %3954 = vpow2.f32 %v1872_v47  ;;  %v1874_v50 = vmul.f32 1.442695, %v1869_v48 }
 0xbab   : > { %3956 = vpow2.f32 %v1874_v50 }
 0xbb3   : > { %v3955_v51 = vpop.eup %3954 }
 0xbb4   : > { %v1880_v52 = vsel %vm1083_vm2, %v3955_v51, 0.0 }
 0xbb5   : > { %v3957_v53 = vpop.eup %3956  ;;  %1881 = vadd.xlane.f32.xlu0 %v1880_v52 }
 0xbb6   : > { %v1883_v54 = vsel %vm1083_vm2, %v3957_v53, 0.0 }
 0xbb7   : > { %1884 = vadd.xlane.f32.xlu1 %v1883_v54  ;;  %v1864_v55 = vpop.xlane.xlu0 %1863 }
 0xbb8   : > { %v1870_v35 = vsub.f32 %v1849_v36, %v1864_v55  ;;  %v3816_v36 = vld [vmem:[#allocation12 + $0x30] sm:$0xff]  }
 0xbba   : > { %v1876_v56 = vmul.f32 1.442695, %v1870_v35  ;;  %v3265_v35 = vld [vmem:[#allocation14] ss:$0 sm:$0xff] }
 0xbbb   : > { %v1867_v59 = vpop.xlane.xlu0 %1866 }
 0xbbc   : > { %3958 = vpow2.f32 %v1876_v56  ;;  %v1871_v60 = vsub.f32 %v1852_v40, %v1867_v59 }
 0xbbe   : > { %v1878_v61 = vmul.f32 1.442695, %v1871_v60 }
 0xbc0   : > { %3960 = vpow2.f32 %v1878_v61 }
 0xbc6   : > { %v3959_v62 = vpop.eup %3958 }
 0xbc7   : > { %v1886_v63 = vsel %vm1083_vm2, %v3959_v62, 0.0 }
 0xbc8   : > { %1887 = vadd.xlane.f32.xlu0 %v1886_v63 }
 0xbca   : > { %v3961_v0 = vpop.eup %3960 }
 0xbcb   : > { %v1889_v37 = vsel %vm1083_vm2, %v3961_v0, 0.0 }
 0xbcc   : > { %1890 = vadd.xlane.f32.xlu1 %v1889_v37 }
 0xbdd   : > { %1949 = vrot.lane.b32.xlu1 %v5027_v46, %s4498_s30 }
 0xbde   : > { %1902 = vrot.lane.b32.xlu0 %v5029_v49, %s4498_s30 }
 0xbe1   : > { %1474 = vrot.lane.b32.xlu1 %v5125_v6, %s4498_s30 }
 0xbe2   : > { %1478 = vrot.lane.b32.xlu0 %v5131_v21, %s4498_s30 }
 0xbe5   : > { %1476 = vrot.lane.b32.xlu1 %v5127_v8, %s4498_s30 }
 0xbe6   : > { %1737 = vrot.lane.b32.xlu0 %v1679_v17, %s4497_s3 }
 0xbe9   : > { %1480 = vrot.lane.b32.xlu1 %v5133_v23, %s4498_s30 }
 0xbea   : > { %1741 = vrot.lane.b32.xlu0 %v1726_v31, %s4497_s3  ;;  %v3815_v31 = vld [vmem:[#allocation12 + $0x28] sm:$0xff]  }
 0xbed   : > { %1739 = vrot.lane.b32.xlu1 %v1682_v22, %s4497_s3 }
 0xbf1   : > { %1743 = vrot.lane.b32.xlu1 %v1729_v33, %s4497_s3  ;;  %s4384_s3 = sshll.u32 %s4499_s15, 4  ;;  %s4385_s3 = int_to_ptr.vmem [resolvable:$false] %s4384_s3 }
 0xbf2   : > { %s4386_s30 = scalar_lea.vmem %s4385_s3, 1024  ;;  %p4387_p12 = scmp.lt.s32.totalorder %s5301_s19, %s4385_s3 }
 0xc42   : > { %v1882_v49 = vpop.xlane.xlu0 %1881 }
 0xc44   : > { %v1885_v46 = vpop.xlane.xlu1 %1884 }
 0xc45   : > { %3962 = vrcp.f32 %v1885_v46 }
 0xc46   : > { %3964 = vrcp.f32 %v1882_v49  ;;  %v4011_v49 = vld [vmem:[%s4948_s25 + $0x8] sm:$0xff] }
 0xc4f   : > { %v3963_v6 = vpop.eup %3962 }
 0xc50   : > { %v3965_v1 = vpop.eup %3964  ;;  %v1897_v57 = vmul.f32 %v3963_v6, %v3957_v53 }
 0xc51   : > { %v1896_v8 = vmul.f32 %v3965_v1, %v3955_v51 }
 0xc53   : > { %v1900_v23 = vpack.c.bf16 %v1897_v57, %v1896_v8  ;;  %v4013_v8 = vld [vmem:[%s4948_s25 + $0x18] sm:$0xff] }
 0xc55   : > { %v1888_v21 = vpop.xlane.xlu0 %1887 }
 0xc56   : > { %3966 = vrcp.f32 %v1888_v21  ;;  %v4012_v21 = vld [vmem:[%s4948_s25 + $0x10] sm:$0xff] }
 0xc59   : > { %v1891_v58 = vpop.xlane.xlu1 %1890  ;;  %v1903_v2 = vpop.permute.xlu0 %1902 }
 0xc5a   : > { %3968 = vrcp.f32 %v1891_v58  ;;  %3564 = vmatpush3.bf16.msra.mxu1 %v1903_v2  ;;  %v3818_v2 = vld [vmem:[#allocation18] ss:$16 sps:$4 sm:$0xff]  }
 0xc5b   : > { %3575 = vmatprep.subr.bf16.mxu1 %v3810_v26 }
 0xc5d   : > { %v1950_v3 = vpop.permute.xlu1 %1949  ;;  %3566 = vmatmul.mubr.msk.bf16.vlgmr.msra.gmra.mrb[28].mxu1 %vm1083_vm2, %v1900_v23  ;;  %v1479_v4 = vpop.permute.xlu0 %1478  ;;  %v3820_v23 = vld [vmem:[#allocation18 + $0x4] ss:$16 sps:$4 sm:$0xff]  }
 0xc5e   : > { %1489 = vst.msk [vmem:[#allocation2 + $0x10] sm:$0xff] %vm1486_vm3, %v1479_v4  ;;  %3570 = vmatpush3.bf16.msra.mxu0 %v1950_v3  ;;  %3576 = vmatpush3.bf16.msra.mxu1 %v3810_v26  ;;  %v3821_v3 = vld [vmem:[#allocation18 + $0x8] ss:$16 sps:$4 sm:$0xff]   ;;  %v3823_v4 = vld [vmem:[#allocation18 + $0xc] ss:$16 sps:$4 sm:$0xff]  }
 0xc5f   : > { %3577 = vmatprep.subr.bf16.mxu1 %v3811_v27  ;;  %2425 = vmatprep.subr.bf16.mxu0 %v3820_v23 }
 0xc60   : > { %v3967_v9 = vpop.eup %3966 }
 0xc61   : > { %v1475_v5 = vpop.permute.xlu1 %1474  ;;  %v1738_v7 = vpop.permute.xlu0 %1737  ;;  %v1898_v11 = vmul.f32 %v3967_v9, %v3959_v62  ;;  %v3824_v9 = vld [vmem:[#allocation18 + $0x20] ss:$16 sps:$4 sm:$0xff]  }
 0xc62   : > { %1487 = vst.msk [vmem:[#allocation2] sm:$0xff] %vm1486_vm3, %v1475_v5  ;;  %3578 = vmatpush3.bf16.msra.mxu1 %v3811_v27  ;;  %v3826_v5 = vld [vmem:[#allocation18 + $0x24] ss:$16 sps:$4 sm:$0xff]  }
 0xc63   : > { %1750 = vst.msk [vmem:[#allocation2] sm:$0xff] %vm1749_vm4, %v1738_v7  ;;  %3579 = vmatprep.subr.bf16.mxu1 %v3812_v28  ;;  %v3829_v7 = vld [vmem:[#allocation18 + $0x2c] ss:$16 sps:$4 sm:$0xff]  }
 0xc64   : > { %v3969_v10 = vpop.eup %3968 }
 0xc65   : > { %v1899_v12 = vmul.f32 %v3969_v10, %v3961_v0  ;;  %v1477_v13 = vpop.permute.xlu1 %1476  ;;  %v1742_v17 = vpop.permute.xlu0 %1741  ;;  %v4010_v0 = vld [vmem:[%s4948_s25] sm:$0xff]  ;;  %s2988_s25 = scalar_lea.sflag [#allocation5], %s4942_s24 }
 0xc66   : > { %1488 = vst.msk [vmem:[#allocation2 + $0x8] sm:$0xff] %vm1486_vm3, %v1477_v13  ;;  %3580 = vmatpush3.bf16.msra.mxu1 %v3812_v28  ;;  %v3827_v10 = vld [vmem:[#allocation18 + $0x28] ss:$16 sps:$4 sm:$0xff]  }
 0xc67   : > { %1752 = vst.msk [vmem:[#allocation2 + $0x10] sm:$0xff] %vm1749_vm4, %v1742_v17  ;;  %v1901_v19 = vpack.c.bf16 %v1899_v12, %v1898_v11  ;;  %3581 = vmatprep.subr.bf16.mxu1 %v3813_v29 }
 0xc69   : > { %v1481_v22 = vpop.permute.xlu1 %1480  ;;  %3572 = vmatmul.mubr.msk.bf16.vlgmr.msra.gmra.mrb[40].mxu0 %vm1083_vm2, %v1901_v19 }
 0xc6a   : > { %1490 = vst.msk [vmem:[#allocation2 + $0x18] sm:$0xff] %vm1486_vm3, %v1481_v22  ;;  %2457 = vmatprep.mubr.bf16.mxu0 %v4493_v39  ;;  %3582 = vmatpush3.bf16.msra.mxu1 %v3813_v29 }
 0xc6b   : > { %3583 = vmatprep.subr.bf16.mxu1 %v3814_v30  ;;  %2426 = vmatpush1.bf16.msra.mxu0 %v3818_v2 }
 0xc6c   : > { %2427 = vmatprep.subr.bf16.mxu0 %v3826_v5 }
 0xc6d   : > { %v1740_v24 = vpop.permute.xlu1 %1739 }
 0xc6e   : > { %1751 = vst.msk [vmem:[#allocation2 + $0x8] sm:$0xff] %vm1749_vm4, %v1740_v24  ;;  %3584 = vmatpush3.bf16.msra.mxu1 %v3814_v30 }
 0xc6f   : > { %3585 = vmatprep.subr.bf16.mxu1 %v3815_v31  ;;  %2428 = vmatpush1.bf16.msra.mxu0 %v3824_v9 }
 0xc71   : > { %v1744_v25 = vpop.permute.xlu1 %1743 }
 0xc72   : > { %1753 = vst.msk [vmem:[#allocation2 + $0x18] sm:$0xff] %vm1749_vm4, %v1744_v25  ;;  %3586 = vmatpush3.bf16.msra.mxu1 %v3815_v31 }
 0xc73   : > { %3587 = vmatprep.subr.bf16.mxu1 %v3816_v36 }
 0xc76   : > { %3588 = vmatpush3.bf16.msra.mxu1 %v3816_v36  ;;  %v3835_v36 = vld [vmem:[#allocation18 + $0x4c] ss:$16 sps:$4 sm:$0xff]  }
 0xc77   : > { %3589 = vmatprep.subr.bf16.mxu1 %v3817_v38 }
 0xc7a   : > { %3590 = vmatpush3.bf16.msra.mxu1 %v3817_v38  ;;  %v3833_v38 = vld [vmem:[#allocation18 + $0x48] ss:$16 sps:$4 sm:$0xff]  }
 0xc7b   : > { %2478 = vmatprep.subr.bf16.mxu1 %v3823_v4 }
 0xd30   : > { %v1942_v32 = vpop.f32.mrb[28].mxu1 }
 0xd31   : > { %2000 = vrot.lane.b32.xlu0 %v1942_v32, %s4496_s1  ;;  %v3567_v33 = vpop.f32.mrb[29].mxu1 }
 0xd32   : > { %v1945_v34 = vpop.f32.mrb[30].mxu1 }
 0xd33   : > { %2002 = vrot.lane.b32.xlu1 %v1945_v34, %s4496_s1  ;;  %v3568_v14 = vpop.f32.mrb[31].mxu1  ;;  %v3832_v34 = vld [vmem:[#allocation18 + $0x44] ss:$16 sps:$4 sm:$0xff]  }
 0xd34   : > { %v3830_v14 = vld [vmem:[#allocation18 + $0x40] ss:$16 sps:$4 sm:$0xff]   ;;  %2429 = vmatprep.subr.bf16.mxu0 %v3832_v34 }
 0xd35   : > { %2430 = vmatpush1.bf16.msra.mxu0 %v3830_v14  ;;  %v3868_v14 = vld [vmem:[#allocation21] sm:$0xff]  }
 0xd3c   : > { %v1989_v40 = vpop.f32.mrb[40].mxu0 }
 0xd3d   : > { %2004 = vrot.lane.b32.xlu0 %v1989_v40, %s4496_s1  ;;  %v3573_v41 = vpop.f32.mrb[41].mxu0  ;;  %v3838_v40 = vld [vmem:[#allocation18 + $0x64] ss:$16 sps:$4 sm:$0xff]  }
 0xd3e   : > { %v1992_v42 = vpop.f32.mrb[42].mxu0  ;;  %v3841_v41 = vld [vmem:[#allocation18 + $0x6c] ss:$16 sps:$4 sm:$0xff]   ;;  %2431 = vmatprep.subr.bf16.mxu0 %v3838_v40 }
 0xd3f   : > { %2006 = vrot.lane.b32.xlu1 %v1992_v42, %s4496_s1  ;;  %v3574_v43 = vpop.f32.mrb[43].mxu0  ;;  %v3836_v42 = vld [vmem:[#allocation18 + $0x60] ss:$16 sps:$4 sm:$0xff]   ;;  %s4380_s1 = scalar_lea.vmem %s5301_s19, 512 }
 0xd40   : > { %v3839_v43 = vld [vmem:[#allocation18 + $0x68] ss:$16 sps:$4 sm:$0xff]   ;;  %2432 = vmatpush1.bf16.msra.mxu0 %v3836_v42  ;;  %v3870_v40 = vld [vmem:[#allocation21 + $0x48] sm:$0xff]   ;;  %p4381_p2 = scmp.ne.s32.totalorder %s5301_s19, %s4380_s1  ;;  %p4388_p0 = scmp.lt.s32.totalorder %s4386_s30, %s4380_s1 }
 0xd42   : > { %p4382_p10 = pnand %p4381_p2, %p5416_p8  ;;  %p4389_p5 = por %p4388_p0, %p4387_p12 }
 0xd44   : > { %p4383_p11 = pneg %p4382_p10 }
 0xd46   : > { %p4390_p7 = pnand %p4389_p5, %p4383_p11 }
 0xda3   : > { %v2001_v44 = vpop.permute.xlu0 %2000 }
 0xda4   : > { %2013 = vst.msk [vmem:[#allocation2] sm:$0xff] %vm2012_vm5, %v2001_v44  ;;  %v3844_v44 = vld [vmem:[#allocation18 + $0x84] ss:$16 sps:$4 sm:$0xff]  }
 0xda5   : > { %v2003_v45 = vpop.permute.xlu1 %2002  ;;  %2433 = vmatprep.subr.bf16.mxu0 %v3844_v44 }
 0xda6   : > { %2014 = vst.msk [vmem:[#allocation2 + $0x8] sm:$0xff] %vm2012_vm5, %v2003_v45  ;;  %v3847_v45 = vld [vmem:[#allocation18 + $0x8c] ss:$16 sps:$4 sm:$0xff]  }
 0xdab   : > { %v2017_v47 = vld [vmem:[#allocation2] sm:$0xff] }
 0xdad   : > { %v2018_v48 = vld [vmem:[#allocation2 + $0x8] sm:$0xff] }
 0xdae   : > { %v2021_v50 = vpack.c.bf16 %v2018_v48, %v2017_v47  ;;  %v3842_v47 = vld [vmem:[#allocation18 + $0x80] ss:$16 sps:$4 sm:$0xff]   ;;  %v3845_v48 = vld [vmem:[#allocation18 + $0x88] ss:$16 sps:$4 sm:$0xff]  }
 0xdaf   : > { %v2005_v51 = vpop.permute.xlu0 %2004  ;;  %2434 = vmatpush1.bf16.msra.mxu0 %v3842_v47  ;;  %v3875_v47 = vld [vmem:[#allocation21 + $0xd0] sm:$0xff]  }
 0xdb0   : > { %2015 = vst.msk [vmem:[#allocation2 + $0x10] sm:$0xff] %vm2012_vm5, %v2005_v51  ;;  %3591 = vmatprep.mubr.bf16.mxu1 %v2021_v50  ;;  %v3850_v50 = vld [vmem:[#allocation18 + $0xa4] ss:$16 sps:$4 sm:$0xff]   ;;  %v3853_v51 = vld [vmem:[#allocation18 + $0xac] ss:$16 sps:$4 sm:$0xff]  }
 0xdb1   : > { %v2007_v52 = vpop.permute.xlu1 %2006  ;;  %2435 = vmatprep.subr.bf16.mxu0 %v3850_v50  ;;  %v3877_v50 = vld [vmem:[#allocation21 + $0x90] sm:$0xff]  }
 0xdb2   : > { %2016 = vst.msk [vmem:[#allocation2 + $0x18] sm:$0xff] %vm2012_vm5, %v2007_v52  ;;  %v3848_v52 = vld [vmem:[#allocation18 + $0xa0] ss:$16 sps:$4 sm:$0xff]  }
 0xdb3   : > { %2436 = vmatpush1.bf16.msra.mxu0 %v3848_v52  ;;  %v3880_v52 = vld [vmem:[#allocation21 + $0x18] sm:$0xff]  }
 0xdb7   : > { %v2019_v53 = vld [vmem:[#allocation2 + $0x10] sm:$0xff] }
 0xdb9   : > { %v2020_v54 = vld [vmem:[#allocation2 + $0x18] sm:$0xff] }
 0xdba   : > { %v2022_v55 = vpack.c.bf16 %v2020_v54, %v2019_v53  ;;  %v3851_v53 = vld [vmem:[#allocation18 + $0xa8] ss:$16 sps:$4 sm:$0xff]   ;;  %v3856_v54 = vld [vmem:[#allocation18 + $0xc4] ss:$16 sps:$4 sm:$0xff]  }
 0xdbb   : > { %2437 = vmatprep.subr.bf16.mxu0 %v3856_v54  ;;  %v3882_v54 = vld [vmem:[#allocation21 + $0x60] sm:$0xff]  }
 0xdbc   : > { %3592 = vmatmul.mubr.bf16.vlgmr.msra.gmra.mrb[32].mxu1 %v2022_v55  ;;  %v3859_v55 = vld [vmem:[#allocation18 + $0xcc] ss:$16 sps:$4 sm:$0xff]  }
 0xdbd   : > { %2510 = vmatprep.mubr.bf16.mxu1 %v4493_v39  ;;  %2479 = vmatpush1.bf16.msra.mxu1 %v3821_v3 }
 0xdbe   : > { %2480 = vmatprep.subr.bf16.mxu1 %v3829_v7 }
 0xdc1   : > { %2481 = vmatpush1.bf16.msra.mxu1 %v3827_v10 }
 0xdc2   : > { %2482 = vmatprep.subr.bf16.mxu1 %v3835_v36 }
 0xdc5   : > { %2483 = vmatpush1.bf16.msra.mxu1 %v3833_v38  ;;  %v3869_v38 = vld [vmem:[#allocation21 + $0x80] sm:$0xff]  }
 0xdc6   : > { %2484 = vmatprep.subr.bf16.mxu1 %v3841_v41  ;;  %v3871_v41 = vld [vmem:[#allocation21 + $0xc8] sm:$0xff]  }
 0xdc9   : > { %2485 = vmatpush1.bf16.msra.mxu1 %v3839_v43  ;;  %v3873_v43 = vld [vmem:[#allocation21 + $0x88] sm:$0xff]  }
 0xdca   : > { %2486 = vmatprep.subr.bf16.mxu1 %v3847_v45  ;;  %v3874_v45 = vld [vmem:[#allocation21 + $0x50] sm:$0xff]  }
 0xdcd   : > { %2487 = vmatpush1.bf16.msra.mxu1 %v3845_v48  ;;  %v3876_v48 = vld [vmem:[#allocation21 + $0x10] sm:$0xff]  }
 0xdce   : > { %2488 = vmatprep.subr.bf16.mxu1 %v3853_v51  ;;  %v3879_v51 = vld [vmem:[#allocation21 + $0xd8] sm:$0xff]  }
 0xdd1   : > { %2489 = vmatpush1.bf16.msra.mxu1 %v3851_v53  ;;  %v3881_v53 = vld [vmem:[#allocation21 + $0x98] sm:$0xff]  }
 0xdd2   : > { %2490 = vmatprep.subr.bf16.mxu1 %v3859_v55  ;;  %v3883_v55 = vld [vmem:[#allocation21 + $0xe0] sm:$0xff]  }
 0xe8f   : > { %v3593_v56 = vpop.f32.mrb[32].mxu1 }
 0xe90   : > { %v2127_v59 = vpop.f32.mrb[33].mxu1  ;;  %v2136_v63 = vadd.f32 %v3593_v56, %v3265_v35  ;;  %v3857_v56 = vld [vmem:[#allocation18 + $0xc8] ss:$16 sps:$4 sm:$0xff]  }
 0xe91   : > { %v2128_v60 = vadd.f32 %v3265_v35, %v2127_v59  ;;  %v3594_v61 = vpop.f32.mrb[34].mxu1  ;;  %v3862_v59 = vld [vmem:[#allocation18 + $0xe4] ss:$16 sps:$4 sm:$0xff]   ;;  %2491 = vmatpush1.bf16.msra.mxu1 %v3857_v56 }
 0xe92   : > { %v2130_v62 = vpop.f32.mrb[35].mxu1  ;;  %v5219_v1 = vadd.f32 %v4012_v21, %v2136_v63  ;;  %v2139_v57 = vadd.f32 %v3594_v61, %v3265_v35  ;;  %v3860_v61 = vld [vmem:[#allocation18 + $0xe0] ss:$16 sps:$4 sm:$0xff]   ;;  %v3866_v63 = vld [vmem:[#allocation21 + $0x40] sm:$0xff]  }
 0xe93   : > { %v5212_v37 = vadd.f32 %v4010_v0, %v2128_v60  ;;  %v2131_v46 = vadd.f32 %v3265_v35, %v2130_v62  ;;  %v3854_v35 = vld [vmem:[#allocation18 + $0xc0] ss:$16 sps:$4 sm:$0xff]   ;;  %v3865_v60 = vld [vmem:[#allocation18 + $0xec] ss:$16 sps:$4 sm:$0xff]   ;;  %v3863_v62 = vld [vmem:[#allocation18 + $0xe8] ss:$16 sps:$4 sm:$0xff]  }
 0xe94   : > { %v5224_v58 = vadd.f32 %v4013_v8, %v2139_v57  ;;  %2438 = vmatpush1.bf16.msra.mxu0 %v3854_v35  ;;  %2492 = vmatprep.subr.bf16.mxu1 %v3865_v60  ;;  %v3867_v0 = vld [vmem:[#allocation21 + $0xc0] sm:$0xff]   ;;  %v3887_v60 = vld [vmem:[#allocation21 + $0xe8] sm:$0xff]  }
 0xe95   : > { %v5215_v6 = vadd.f32 %v4011_v49, %v2131_v46  ;;  %2146 = vadd.xlane.f32.xlu0 %v5212_v37  ;;  %2439 = vmatprep.subr.bf16.mxu0 %v3862_v59  ;;  %v3884_v35 = vld [vmem:[#allocation21 + $0x20] sm:$0xff]   ;;  %v3886_v59 = vld [vmem:[#allocation21 + $0x68] sm:$0xff]  }
 0xe96   : > { %2493 = vmatpush1.bf16.msra.mxu1 %v3863_v62  ;;  %v3885_v56 = vld [vmem:[#allocation21 + $0xa0] sm:$0xff]   ;;  %v3889_v62 = vld [vmem:[#allocation21 + $0xa8] sm:$0xff]  }
 0xe97   : > { %2148 = vadd.xlane.f32.xlu1 %v5215_v6  ;;  %3431 = vmatprep.subr.bf16.mxu1 %v3867_v0  ;;  %v3891_v0 = vld [vmem:[#allocation21 + $0xf0] sm:$0xff]  }
 0xe98   : > { %2440 = vmatpush1.bf16.msra.mxu0 %v3860_v61  ;;  %v3888_v61 = vld [vmem:[#allocation21 + $0x28] sm:$0xff]  }
 0xe99   : > { %2150 = vadd.xlane.f32.xlu0 %v5219_v1  ;;  %3403 = vmatprep.subr.bf16.mxu0 %v3866_v63  ;;  %v3890_v63 = vld [vmem:[#allocation21 + $0x70] sm:$0xff]  }
 0xe9d   : > { %2152 = vadd.xlane.f32.xlu0 %v5224_v58 }
 0xf22   : > { %v2147_v11 = vpop.xlane.xlu0 %2146 }
 0xf23   : > { %v2154_v12 = vmul.f32 0.0078125, %v2147_v11  ;;  %v3274_v11 = vld [vmem:[#allocation15] ss:$0 sm:$0xff] }
 0xf24   : > { %v2149_v13 = vpop.xlane.xlu1 %2148 }
 0xf25   : > { %v5228_v17 = vsub.f32 %v5212_v37, %v2154_v12  ;;  %v2155_v19 = vmul.f32 0.0078125, %v2149_v13 }
 0xf26   : > { %v2151_v22 = vpop.xlane.xlu0 %2150 }
 0xf27   : > { %v5231_v24 = vsub.f32 %v5215_v6, %v2155_v19  ;;  %v2156_v25 = vmul.f32 0.0078125, %v2151_v22  ;;  %v2162_v26 = vmul.f32 %v5228_v17, %v5228_v17 }
 0xf29   : > { %v5236_v27 = vsub.f32 %v5219_v1, %v2156_v25  ;;  %2166 = vadd.xlane.f32.xlu0 %v2162_v26  ;;  %v2163_v28 = vmul.f32 %v5231_v24, %v5231_v24  ;;  %v3275_v26 = vld [vmem:[#allocation17] ss:$0 sm:$0xff] }
 0xf2a   : > { %v2153_v29 = vpop.xlane.xlu0 %2152 }
 0xf2b   : > { %v2157_v30 = vmul.f32 0.0078125, %v2153_v29  ;;  %2168 = vadd.xlane.f32.xlu1 %v2163_v28  ;;  %v2164_v31 = vmul.f32 %v5236_v27, %v5236_v27 }
 0xf2d   : > { %v5243_v32 = vsub.f32 %v5224_v58, %v2157_v30  ;;  %2170 = vadd.xlane.f32.xlu0 %v2164_v31 }
 0xf2f   : > { %v2165_v33 = vmul.f32 %v5243_v32, %v5243_v32 }
 0xf31   : > { %2172 = vadd.xlane.f32.xlu1 %v2165_v33 }
 0xfb6   : > { %v2167_v46 = vpop.xlane.xlu0 %2166 }
 0xfb7   : > { %v2174_v49 = vmul.f32 0.0078125, %v2167_v46  ;;  %v3892_v46 = vld [vmem:[#allocation21 + $0x30] sm:$0xff]  }
 0xfb8   : > { %v2169_v21 = vpop.xlane.xlu1 %2168 }
 0xfb9   : > { %v2178_v57 = vadd.f32 1e-06, %v2174_v49  ;;  %v2175_v8 = vmul.f32 0.0078125, %v2169_v21  ;;  %v3893_v49 = vld [vmem:[#allocation21 + $0xb0] sm:$0xff]   ;;  %v3894_v21 = vld [vmem:[#allocation21 + $0x78] sm:$0xff]  }
 0xfba   : > { %v2171_v2 = vpop.xlane.xlu0 %2170 }
 0xfbb   : > { %3970 = vrsqrt.f32 %v2178_v57  ;;  %v2179_v23 = vadd.f32 1e-06, %v2175_v8  ;;  %v2176_v3 = vmul.f32 0.0078125, %v2171_v2  ;;  %v3895_v57 = vld [vmem:[#allocation21 + $0xf8] sm:$0xff]  }
 0xfbc   : > { %v3896_v8 = vld [vmem:[#allocation21 + $0x38] sm:$0xff]  }
 0xfbd   : > { %3972 = vrsqrt.f32 %v2179_v23  ;;  %v2180_v4 = vadd.f32 1e-06, %v2176_v3  ;;  %v3897_v2 = vld [vmem:[#allocation21 + $0xb8] sm:$0xff]   ;;  %v2259_v3 = vsub.s32 3, %v5010_v15 }
 0xfbe   : > { %v2173_v5 = vpop.xlane.xlu1 %2172  ;;  %v631_v23 = vld [vmem:[#allocation20] sm:$0xf] }
 0xfbf   : > { %3974 = vrsqrt.f32 %v2180_v4  ;;  %v2177_v7 = vmul.f32 0.0078125, %v2173_v5  ;;  %v2248_v4 = vrot.slane %v631_v23, %v735_v16  ;;  %v2256_v5 = vrot.slane %v631_v23, %v743_v20 }
 0xfc1   : > { %v2181_v9 = vadd.f32 1e-06, %v2177_v7  ;;  %v2252_v7 = vrot.slane %v631_v23, %v739_v18 }
 0xfc3   : > { %3976 = vrsqrt.f32 %v2181_v9  ;;  %v2260_v9 = vrot.slane %v631_v23, %v2259_v3 }
 0xfc5   : > { %v3971_v10 = vpop.eup %3970 }
 0xfc6   : > { %v2186_v12 = vmul.f32 %v3971_v10, %v5228_v17 }
 0xfc7   : > { %v3973_v13 = vpop.eup %3972 }
 0xfc8   : > { %v2187_v19 = vmul.f32 %v3973_v13, %v5231_v24  ;;  %v2196_v22 = vmul.f32 %v3274_v11, %v2186_v12 }
 0xfc9   : > { %v3975_v25 = vpop.eup %3974 }
 0xfca   : > { %v2197_v28 = vmul.f32 %v3274_v11, %v2187_v19  ;;  %v2206_v29 = vadd.f32 %v3275_v26, %v2196_v22  ;;  %v2188_v31 = vmul.f32 %v3975_v25, %v5236_v27  ;;  %v3872_v27 = vld [vmem:[#allocation21 + $0x8] sm:$0xff]  }
 0xfcc   : > { %v2207_v30 = vadd.f32 %v3275_v26, %v2197_v28  ;;  %v2198_v17 = vmul.f32 %v3274_v11, %v2188_v31 }
 0xfcd   : > { %v3977_v33 = vpop.eup %3976 }
 0xfce   : > { %v2210_v34 = vpack.c.bf16 %v2207_v30, %v2206_v29  ;;  %v2189_v36 = vmul.f32 %v3977_v33, %v5243_v32  ;;  %v2208_v32 = vadd.f32 %v3275_v26, %v2198_v17 }
 0xfd0   : > { %2458 = vmatmul.mubr.bf16.vlgmr.msra.gmra.mrb[44].mxu0 %v2210_v34  ;;  %2511 = vmatmul.mubr.bf16.vlgmr.msra.gmra.mrb[36].mxu1 %v2210_v34  ;;  %v2199_v24 = vmul.f32 %v3274_v11, %v2189_v36 }
 0xfd1   : > { %2467 = vmatprep.mubr.bf16.mxu0 %v4493_v39  ;;  %2520 = vmatprep.mubr.bf16.mxu1 %v4493_v39  ;;  %v3878_v39 = vld [vmem:[#allocation21 + $0x58] sm:$0xff]  }
 0xfd2   : > { %v2209_v42 = vadd.f32 %v3275_v26, %v2199_v24  ;;  %3404 = vmatpush3.bf16.msra.mxu0 %v3868_v14  ;;  %3432 = vmatpush3.bf16.msra.mxu1 %v3869_v38 }
 0xfd3   : > { %3405 = vmatprep.subr.bf16.mxu0 %v3870_v40  ;;  %3433 = vmatprep.subr.bf16.mxu1 %v3871_v41 }
 0xfd4   : > { %v2211_v44 = vpack.c.bf16 %v2209_v42, %v2208_v32 }
 0xfd6   : > { %3406 = vmatpush3.bf16.msra.mxu0 %v3872_v27  ;;  %3434 = vmatpush3.bf16.msra.mxu1 %v3873_v43 }
 0xfd7   : > { %3407 = vmatprep.subr.bf16.mxu0 %v3874_v45  ;;  %3435 = vmatprep.subr.bf16.mxu1 %v3875_v47 }
 0xfd8   : > { %2468 = vmatmul.mubr.bf16.gmra.mrb[48].mxu0 %v2211_v44  ;;  %2521 = vmatmul.mubr.bf16.gmra.mrb[40].mxu1 %v2211_v44 }
 0xfda   : > { %3408 = vmatpush3.bf16.msra.mxu0 %v3876_v48  ;;  %3436 = vmatpush3.bf16.msra.mxu1 %v3877_v50 }
 0xfdb   : > { %3409 = vmatprep.subr.bf16.mxu0 %v3878_v39  ;;  %3437 = vmatprep.subr.bf16.mxu1 %v3879_v51 }
 0xfde   : > { %3410 = vmatpush3.bf16.msra.mxu0 %v3880_v52  ;;  %3438 = vmatpush3.bf16.msra.mxu1 %v3881_v53 }
 0xfdf   : > { %3411 = vmatprep.subr.bf16.mxu0 %v3882_v54  ;;  %3439 = vmatprep.subr.bf16.mxu1 %v3883_v55 }
 0xfe2   : > { %3412 = vmatpush3.bf16.msra.mxu0 %v3884_v35  ;;  %3440 = vmatpush3.bf16.msra.mxu1 %v3885_v56 }
 0xfe3   : > { %3413 = vmatprep.subr.bf16.mxu0 %v3886_v59  ;;  %3441 = vmatprep.subr.bf16.mxu1 %v3887_v60 }
 0xfe6   : > { %3414 = vmatpush3.bf16.msra.mxu0 %v3888_v61  ;;  %3442 = vmatpush3.bf16.msra.mxu1 %v3889_v62 }
 0xfe7   : > { %3415 = vmatprep.subr.bf16.mxu0 %v3890_v63  ;;  %3443 = vmatprep.subr.bf16.mxu1 %v3891_v0 }
 0xfea   : > { %3416 = vmatpush3.bf16.msra.mxu0 %v3892_v46  ;;  %3444 = vmatpush3.bf16.msra.mxu1 %v3893_v49 }
 0xfeb   : > { %3417 = vmatprep.subr.bf16.mxu0 %v3894_v21  ;;  %3445 = vmatprep.subr.bf16.mxu1 %v3895_v57 }
 0xfee   : > { %3418 = vmatpush3.bf16.msra.mxu0 %v3896_v8  ;;  %3446 = vmatpush3.bf16.msra.mxu1 %v3897_v2 }
0x10a3   : > { %v2459_v10 = vpop.f32.mrb[44].mxu0  ;;  %v2512_v11 = vpop.f32.mrb[36].mxu1 }
0x10a4   : > { %v2460_v12 = vadd.f32 %v2459_v10, %v2248_v4  ;;  %v2513_v13 = vadd.f32 %v2512_v11, %v2256_v5  ;;  %v2461_v19 = vpop.f32.mrb[45].mxu0  ;;  %v2514_v22 = vpop.f32.mrb[37].mxu1 }
0x10a5   : > { %v2462_v25 = vadd.f32 %v2461_v19, %v2252_v7  ;;  %v2515_v26 = vadd.f32 %v2514_v22, %v2260_v9  ;;  %v2463_v28 = vpop.f32.mrb[46].mxu0  ;;  %v2516_v29 = vpop.f32.mrb[38].mxu1 }
0x10a6   : > { %v2547_v30 = vmul.f32 0.70710677, %v2460_v12  ;;  %v2549_v31 = vmul.f32 0.70710677, %v2513_v13  ;;  %v2464_v20 = vadd.f32 %v2463_v28, %v2248_v4  ;;  %v5260_v34 = vadd.f32 %v2516_v29, %v2256_v5  ;;  %v2465_v15 = vpop.f32.mrb[47].mxu0  ;;  %v2518_v18 = vpop.f32.mrb[39].mxu1 }
0x10a7   : > { %v2548_v16 = vmul.f32 0.70710677, %v2462_v25  ;;  %v2550_v33 = vmul.f32 0.70710677, %v2515_v26  ;;  %v2466_v36 = vadd.f32 %v2465_v15, %v2252_v7  ;;  %v5262_v14 = vadd.f32 %v2518_v18, %v2260_v9 }
0x10a8   : > { %3978 = verf.f32 %v2547_v30  ;;  %v2551_v38 = vmul.f32 0.70710677, %v2464_v20  ;;  %v2553_v40 = vmul.f32 0.70710677, %v5260_v34  ;;  %v2531_v46 = vmul.f32 0.5, %v2460_v12 }
0x10a9   : > { %3980 = verf.f32 %v2549_v31  ;;  %v2552_v41 = vmul.f32 0.70710677, %v2466_v36  ;;  %v2554_v24 = vmul.f32 0.70710677, %v5262_v14  ;;  %v2533_v49 = vmul.f32 0.5, %v2513_v13 }
0x10aa   : > { %3982 = verf.f32 %v2548_v16  ;;  %v2532_v2 = vmul.f32 0.5, %v2462_v25  ;;  %v2537_v22 = vmul.f32 0.5, %v5260_v34  ;;  %v2536_v25 = vmul.f32 0.5, %v2466_v36 }
0x10ab   : > { %3984 = verf.f32 %v2550_v33  ;;  %v2469_v17 = vpop.f32.mrb[48].mxu0  ;;  %v2522_v27 = vpop.f32.mrb[40].mxu1 }
0x10ac   : > { %3986 = verf.f32 %v2551_v38  ;;  %v5266_v42 = vadd.f32 %v2469_v17, %v2248_v4  ;;  %v2471_v43 = vpop.f32.mrb[49].mxu0  ;;  %v5268_v32 = vadd.f32 %v2522_v27, %v2256_v5  ;;  %v2524_v45 = vpop.f32.mrb[41].mxu1 }
0x10ad   : > { %3988 = verf.f32 %v2553_v40  ;;  %v5270_v44 = vadd.f32 %v2471_v43, %v2252_v7  ;;  %v2473_v47 = vpop.f32.mrb[50].mxu0  ;;  %v5273_v50 = vadd.f32 %v2524_v45, %v2260_v9  ;;  %v2526_v39 = vpop.f32.mrb[42].mxu1 }
0x10ae   : > { %3990 = verf.f32 %v2552_v41  ;;  %v2555_v48 = vmul.f32 0.70710677, %v5266_v42  ;;  %v2475_v51 = vpop.f32.mrb[51].mxu0  ;;  %v2557_v52 = vmul.f32 0.70710677, %v5268_v32  ;;  %v2528_v53 = vpop.f32.mrb[43].mxu1  ;;  %v2474_v35 = vadd.f32 %v2473_v47, %v2248_v4 }
0x10af   : > { %3992 = verf.f32 %v2554_v24  ;;  %v2556_v54 = vmul.f32 0.70710677, %v5270_v44  ;;  %v2558_v55 = vmul.f32 0.70710677, %v5273_v50  ;;  %v5278_v56 = vadd.f32 %v2526_v39, %v2256_v5 }
0x10b0   : > { %3994 = verf.f32 %v2555_v48  ;;  %v5280_v59 = vadd.f32 %v2475_v51, %v2252_v7  ;;  %v2559_v62 = vmul.f32 0.70710677, %v2474_v35  ;;  %v5282_v63 = vadd.f32 %v2528_v53, %v2260_v9 }
0x10b1   : > { %3996 = verf.f32 %v2557_v52  ;;  %v2561_v21 = vmul.f32 0.70710677, %v5278_v56  ;;  %v2534_v5 = vmul.f32 0.5, %v2515_v26  ;;  %v2535_v7 = vmul.f32 0.5, %v2464_v20 }
0x10b2   : > { %v3979_v60 = vpop.eup %3978  ;;  %3998 = verf.f32 %v2556_v54  ;;  %v2560_v23 = vmul.f32 0.70710677, %v5280_v59  ;;  %v2562_v12 = vmul.f32 0.70710677, %v5282_v63  ;;  %v2538_v20 = vmul.f32 0.5, %v5262_v14 }
0x10b3   : > { %v3981_v61 = vpop.eup %3980  ;;  %4000 = verf.f32 %v2558_v55  ;;  %v2579_v8 = vadd.f32 1.0, %v3979_v60  ;;  %v2539_v51 = vmul.f32 0.5, %v5266_v42  ;;  %v2541_v53 = vmul.f32 0.5, %v5268_v32 }
0x10b4   : > { %v3983_v0 = vpop.eup %3982  ;;  %4002 = verf.f32 %v2559_v62  ;;  %v2581_v4 = vadd.f32 1.0, %v3981_v61  ;;  %v2543_v55 = vmul.f32 0.5, %v2474_v35  ;;  %v2540_v62 = vmul.f32 0.5, %v5270_v44 }
0x10b5   : > { %v3985_v57 = vpop.eup %3984  ;;  %4004 = verf.f32 %v2561_v21  ;;  %v2580_v9 = vadd.f32 1.0, %v3983_v0  ;;  %v2595_v30 = vmul.f32 %v2579_v8, %v2531_v46  ;;  %v2545_v0 = vmul.f32 0.5, %v5278_v56 }
0x10b6   : > { %v3987_v3 = vpop.eup %3986  ;;  %4006 = verf.f32 %v2560_v23  ;;  %v2582_v19 = vadd.f32 1.0, %v3985_v57  ;;  %v2597_v26 = vmul.f32 %v2581_v4, %v2533_v49  ;;  %v2544_v49 = vmul.f32 0.5, %v5280_v59 }
0x10b7   : > { %v3989_v10 = vpop.eup %3988  ;;  %v2583_v11 = vadd.f32 1.0, %v3987_v3  ;;  %4008 = verf.f32 %v2562_v12  ;;  %v2596_v38 = vmul.f32 %v2580_v9, %v2532_v2  ;;  %v2542_v35 = vmul.f32 0.5, %v5273_v50 }
0x10b8   : > { %v3991_v13 = vpop.eup %3990  ;;  %v2585_v28 = vadd.f32 1.0, %v3989_v10  ;;  %v2598_v24 = vmul.f32 %v2582_v19, %v2534_v5  ;;  %v2546_v3 = vmul.f32 0.5, %v5282_v63  ;;  %v3308_v19 = vld [vmem:[#allocation23] ss:$0 sm:$0xff] }
0x10b9   : > { %v3993_v29 = vpop.eup %3992  ;;  %v2599_v31 = vmul.f32 %v2583_v11, %v2535_v7  ;;  %v2584_v16 = vadd.f32 1.0, %v3991_v13 }
0x10ba   : > { %v2601_v33 = vmul.f32 %v2585_v28, %v2537_v22  ;;  %v2586_v15 = vadd.f32 1.0, %v3993_v29  ;;  %v3995_v18 = vpop.eup %3994 }
0x10bb   : > { %v2611_v40 = vpack.c.bf16 %v2599_v31, %v2595_v30  ;;  %v2600_v41 = vmul.f32 %v2584_v16, %v2536_v25  ;;  %v3997_v17 = vpop.eup %3996  ;;  %v2587_v47 = vadd.f32 1.0, %v3995_v18 }
0x10bc   : > { %v2613_v27 = vpack.c.bf16 %v2601_v33, %v2597_v26  ;;  %v2602_v34 = vmul.f32 %v2586_v15, %v2538_v20  ;;  %v3999_v43 = vpop.eup %3998  ;;  %v2589_v52 = vadd.f32 1.0, %v3997_v17 }
0x10bd   : > { %v2612_v36 = vpack.c.bf16 %v2600_v41, %v2596_v38  ;;  %v4001_v45 = vpop.eup %4000  ;;  %v2588_v54 = vadd.f32 1.0, %v3999_v43  ;;  %v2603_v42 = vmul.f32 %v2587_v47, %v2539_v51 }
0x10be   : > { %v2614_v48 = vpack.c.bf16 %v2602_v34, %v2598_v24  ;;  %v4003_v39 = vpop.eup %4002  ;;  %v2590_v21 = vadd.f32 1.0, %v4001_v45  ;;  %v2605_v32 = vmul.f32 %v2589_v52, %v2541_v53 }
0x10bf   : > { %2913 = vmatprep.mubr.bf16.mxu0 %v2612_v36  ;;  %v4005_v14 = vpop.eup %4004  ;;  %v2591_v60 = vadd.f32 1.0, %v4003_v39  ;;  %v2604_v4 = vmul.f32 %v2588_v54, %v2540_v62 }
0x10c0   : > { %2962 = vmatprep.mubr.bf16.mxu1 %v2614_v48  ;;  %2914 = vmatmul.mubr.bf16.vlgmr.msra.gmra.mrb[52].mxu0 %v2611_v40  ;;  %v4007_v61 = vpop.eup %4006  ;;  %v2593_v46 = vadd.f32 1.0, %v4005_v14  ;;  %v2606_v10 = vmul.f32 %v2590_v21, %v2542_v35 }
0x10c1   : > { %2963 = vmatmul.mubr.bf16.vlgmr.msra.gmra.mrb[44].mxu1 %v2613_v27  ;;  %v2607_v57 = vmul.f32 %v2591_v60, %v2543_v55  ;;  %v2592_v8 = vadd.f32 1.0, %v4007_v61  ;;  %v4009_v2 = vpop.eup %4008 }
0x10c2   : > { %v2609_v23 = vmul.f32 %v2593_v46, %v2545_v0  ;;  %v2594_v44 = vadd.f32 1.0, %v4009_v2 }
0x10c3   : > { %v2608_v5 = vmul.f32 %v2592_v8, %v2544_v49  ;;  %v2615_v7 = vpack.c.bf16 %v2607_v57, %v2603_v42 }
0x10c4   : > { %v2617_v56 = vpack.c.bf16 %v2609_v23, %v2605_v32  ;;  %v2610_v9 = vmul.f32 %v2594_v44, %v2546_v3 }
0x10c5   : > { %v2616_v59 = vpack.c.bf16 %v2608_v5, %v2604_v4 }
0x10c6   : > { %v2618_v11 = vpack.c.bf16 %v2610_v9, %v2606_v10 }
0x10c7   : > { %2921 = vmatprep.mubr.bf16.mxu0 %v2616_v59 }
0x10c8   : > { %2922 = vmatmul.mubr.bf16.gmra.mrb[56].mxu0 %v2615_v7  ;;  %2970 = vmatprep.mubr.bf16.mxu1 %v2618_v11 }
0x10c9   : > { %2971 = vmatmul.mubr.bf16.gmra.mrb[48].mxu1 %v2617_v56 }
0x1193   : > { %v3419_v12 = vpop.f32.mrb[52].mxu0 }
0x1194   : > { %v3447_v13 = vpop.f32.mrb[44].mxu1  ;;  %v3420_v50 = vpop.f32.mrb[53].mxu0 }
0x1195   : > { %v3421_v22 = vadd.f32 %v3420_v50, %v3419_v12  ;;  %v3448_v63 = vpop.f32.mrb[45].mxu1  ;;  %v3422_v28 = vpop.f32.mrb[54].mxu0 }
0x1196   : > { %v3449_v25 = vadd.f32 %v3448_v63, %v3447_v13  ;;  %v3450_v29 = vpop.f32.mrb[46].mxu1  ;;  %v3423_v30 = vpop.f32.mrb[55].mxu0 }
0x1197   : > { %v2916_v31 = vadd.f32 %v3421_v22, %v3308_v19  ;;  %v3424_v16 = vadd.f32 %v3423_v30, %v3422_v28  ;;  %v3451_v26 = vpop.f32.mrb[47].mxu1 }
0x1198   : > { %v3452_v33 = vadd.f32 %v3451_v26, %v3450_v29 }
0x1199   : > { %v2965_v20 = vadd.f32 %v3449_v25, %v2916_v31  ;;  %v2919_v15 = vadd.f32 %v3424_v16, %v3308_v19 }
0x119b   : > { %v2979_v18 = vadd.f32 %v2965_v20, %v5212_v37  ;;  %v2968_v38 = vadd.f32 %v3452_v33, %v2919_v15  ;;  %v3425_v40 = vpop.f32.mrb[56].mxu0 }
0x119c   : > { %v3426_v17 = vpop.f32.mrb[57].mxu0  ;;  %v3453_v24 = vpop.f32.mrb[48].mxu1 }
0x119d   : > { %2983 = vst [vmem:[%s617_s13] sm:$0xff] %v2979_v18  ;;  %v2980_v41 = vadd.f32 %v2968_v38, %v5215_v6  ;;  %v3427_v27 = vadd.f32 %v3426_v17, %v3425_v40  ;;  %v3428_v34 = vpop.f32.mrb[58].mxu0  ;;  %v3454_v43 = vpop.f32.mrb[49].mxu1 }
0x119e   : > { %v3429_v36 = vpop.f32.mrb[59].mxu0  ;;  %v3455_v47 = vadd.f32 %v3454_v43, %v3453_v24  ;;  %v3456_v48 = vpop.f32.mrb[50].mxu1 }
0x119f   : > { %2984 = vst [vmem:[%s617_s13 + $0x8] sm:$0xff] %v2980_v41  ;;  %v2924_v45 = vadd.f32 %v3427_v27, %v3308_v19  ;;  %v3430_v37 = vadd.f32 %v3429_v36, %v3428_v34  ;;  %v3457_v39 = vpop.f32.mrb[51].mxu1 }
0x11a0   : > { %v3458_v14 = vadd.f32 %v3457_v39, %v3456_v48 }
0x11a1   : > { %v2973_v51 = vadd.f32 %v3455_v47, %v2924_v45  ;;  %v2927_v52 = vadd.f32 %v3430_v37, %v3308_v19 }
0x11a3   : > { %v2981_v6 = vadd.f32 %v2973_v51, %v5219_v1  ;;  %v2976_v53 = vadd.f32 %v3458_v14, %v2927_v52 }
0x11a5   : > { %2985 = vst [vmem:[%s617_s13 + $0x10] sm:$0xff] %v2981_v6  ;;  %v2982_v54 = vadd.f32 %v2976_v53, %v5224_v58 }
0x11a7   : > { %2986 = vst [vmem:[%s617_s13 + $0x18] sm:$0xff] %v2982_v54 }
0x11a8   : > { %4393 = shalt.err (!%p4390_p7)
}
0x11a9   : > { %s4394_s13 = scalar_lea.hbm %s5307_s16, 512  ;;  %s4398_s17 = scalar_lea.hbm %s5415_s21, 1024 }
0x11aa   : > { %p4395_p6 = scmp.ne.s32.totalorder %s5307_s16, %s4394_s13  ;;  %p4399_p13 = scmp.lt.u32.totalorder %s5307_s16, %s5415_s21 }
0x11ab   : > { %p4400_p1 = scmp.lt.u32.totalorder %s4398_s17, %s4394_s13  ;;  %p4402_p2 = scmp.lt.u32.totalorder %s4394_s13, %s5307_s16 }
0x11ac   : > { %p4396_p9 = pnand %p4395_p6, %p5416_p8 }
0x11ad   : > { %p4401_p3 = por %p4400_p1, %p4399_p13 }
0x11ae   : > { %p4397_p4 = pneg %p4396_p9 }
0x11af   : > { %p4403_p10 = por %p4402_p2, %p4401_p3 }
0x11b1   : > { %p4404_p11 = pnand %p4403_p10, %p4397_p4 }
0x11b3   : > { %4407 = shalt.err (!%p4404_p11)
}
0x11b4   : > { %s4500_s1 = smov 128   ;;  %s4501_s30 = smov 8  }
0x11b5   : > { %3645 = dma.vmem_to_hbm [thread:$0]  (%p5416_p8), %s5301_s19, 512, %s5307_s16, %s2988_s25, %s4500_s1, %s4500_s1, %s4501_s30  }
0x11b6 PF: > { %s5417_s14 = sld [smem:[#allocation33_spill]]  ;;  %p5418_p12 = scmp.ne.s32.totalorder %s5397_s23, 0 }
0x11b7   : > { %p5419_p0 = scmp.ge.s32.totalorder %s4470_s28, 2 }
0x11b9   : > { %p3689_p5 = pnand %p5419_p0, %p5418_p12 }
0x11bc   : > { %s3017_s20 = sand.u32 1, %s5417_s14  }
0x11bd   : > { %s3018_s13 = scalar_lea.sflag [#allocation5], %s3017_s20 }
0x11be   : > { %4453 = dma.done.wait (!%p3689_p5), %s3018_s13, 512  }
0x11bf   : > { %4455 = vsyncadd (!%p3689_p5), %s3018_s13, 4294966784  ;;  %p32_p7 = scmp.ge.s32.totalorder %s4863_s18, 4   ;;  %s5420_s25 = smov %s4462_s26 }
0x11c0   : > { %s5421_s26 = smov %s4466_s27  ;;  %s5422_s27 = smov %s4874_s29 }
0x11c1   : > { %s5423_s28 = smov %s4863_s18  ;;  %34 = sbr.rel (!%p32_p7) target bundleno = 16 (0x10), region = 165 }
0x11c8   :  { %3023 = vsyncpa [#allocation4], 1 }
0x11c9   :  { %3025 = vsyncpa [#allocation4 + $0x1], 1 }
0x11ca   :  { %3026 = vsyncpa [#allocation7], 1 }
0x11cb   :  { %3027 = vsyncpa [#allocation10], 1 }
0x11cc   :  { %3028 = vsyncpa [#allocation13], 1 }
0x11cd   :  { %3029 = vsyncpa [#allocation16], 1 }
0x11ce   :  { %3030 = vsyncpa [#allocation19], 1 }
0x11cf   :  { %3031 = vsyncpa [#allocation22], 1 }
0x11d0   :  { %3032 = vsyncpa [#allocation5], 1 }
0x11d1   :  { %3034 = vsyncpa [#allocation5 + $0x1], 1 }

</bundles_post_ra>
